<compile_context>
chip_gen: v7x
topology: tpu7x:2x2x1
jax: 0.10.0
libtpu: 0.0.40
codegen_flags: <defaults>
</compile_context>

<pallas_src>
import functools

import jax
import jax.numpy as jnp
import numpy as np
from jax.experimental import pallas as pl
from jax.experimental.pallas import tpu as pltpu


def _relu_conv_kernel(x_ref, w_ref, o_ref, patches_ref, *,
                      TH, Wo, KH, KW, stride, dilation):
    # x_ref:       (1, Hp, Wp, Cin)    padded image (compute dtype), resident per n
    # w_ref:       (KH*KW*Cin, Cout)   weights, resident across the whole grid
    # o_ref:       (1, Cout, TH*Wo)    lane-dense flattened-NCHW output tile
    # patches_ref: (TH*Wo, KH*KW*Cin)  im2col scratch (compute dtype)
    Cin = x_ref.shape[-1]
    hi = pl.program_id(1)
    row0 = hi * (TH * stride)          # first padded input row for this H tile

    # Assemble the im2col patch matrix: one slab copy per kernel tap.
    for kh in range(KH):
        for kw in range(KW):
            k0 = (kh * KW + kw) * Cin
            if stride == 1:
                patch = x_ref[0,
                              pl.ds(row0 + kh * dilation, TH),
                              pl.ds(kw * dilation, Wo),
                              :]                                  # (TH, Wo, Cin)
            else:
                # stride > 1 => TH == Ho (single H tile), static strided window.
                # TODO(synk): decompose by stride phase in the wrapper to avoid
                # strided sublane gathers and DMAing unused rows when stride > 1.
                patch = jax.lax.slice(
                    x_ref[0],
                    (kh * dilation, kw * dilation, 0),
                    (kh * dilation + (TH - 1) * stride + 1,
                     kw * dilation + (Wo - 1) * stride + 1,
                     Cin),
                    (stride, stride, 1))
            patches_ref[:, k0:k0 + Cin] = patch.reshape(TH * Wo, Cin)

    # Single fused matmul over all KH*KW taps, f32 accumulation on the MXU.
    acc = jnp.dot(patches_ref[...], w_ref[...],
                  preferred_element_type=jnp.float32)             # (TH*Wo, Cout)
    acc = jnp.maximum(acc, 0.0)                                   # fused ReLU (VPU)
    # Transpose so the store is lane-dense (last dim TH*Wo) and already in
    # flattened NCHW order -> no post-kernel transpose pass over HBM.
    o_ref[0] = acc.T.astype(o_ref.dtype)                          # (Cout, TH*Wo)


def _pick_tile_h(Ho, Wo, stride):
    """Output-row tile TH: divides Ho, keeps TH*Wo lane-dense (multiple of 128)
    when possible, and keeps the per-step matmul M modest."""
    if stride != 1:
        return Ho                      # strided path uses a single static H tile
    cands = [th for th in range(1, Ho + 1)
             if Ho % th == 0 and (th * Wo) % 128 == 0 and th * Wo <= 1024]
    if not cands:
        return Ho                      # fall back: whole image, block == full dim
    multi = [th for th in cands if Ho // th >= 2]   # prefer >1 spatial grid step
    return max(multi) if multi else max(cands)


def relu_conv2d_pallas(x_nchw, weight_oihw, *, stride=1, padding=1, dilation=1,
                       compute_dtype=jnp.bfloat16):
    """relu(F.conv2d(x, weight, stride, padding, dilation)), NCHW in/out."""
    N, Cin, H, W = x_nchw.shape
    Cout, Cin_w, KH, KW = weight_oihw.shape
    assert Cin == Cin_w, "channel mismatch"

    Ho = (H + 2 * padding - dilation * (KH - 1) - 1) // stride + 1
    Wo = (W + 2 * padding - dilation * (KW - 1) - 1) // stride + 1
    Hp, Wp = H + 2 * padding, W + 2 * padding
    K = KH * KW * Cin

    # NCHW -> NHWC, cast to the MXU compute dtype, pad spatially (single fused
    # XLA pass; the *output* side needs no transpose pass at all).
    x_nhwc = jnp.transpose(x_nchw, (0, 2, 3, 1)).astype(compute_dtype)
    x_pad = jnp.pad(x_nhwc, ((0, 0), (padding, padding), (padding, padding), (0, 0)))

    # OIHW -> (KH*KW*Cin, Cout), ordering (kh, kw, cin) to match the im2col fill.
    w2d = jnp.transpose(weight_oihw, (2, 3, 1, 0)).reshape(K, Cout)
    w2d = w2d.astype(compute_dtype)

    TH = _pick_tile_h(Ho, Wo, stride)
    n_th = Ho // TH

    kernel = functools.partial(_relu_conv_kernel, TH=TH, Wo=Wo, KH=KH, KW=KW,
                               stride=stride, dilation=dilation)

    out_flat = pl.pallas_call(
        kernel,
        out_shape=jax.ShapeDtypeStruct((N, Cout, Ho * Wo), x_nchw.dtype),
        grid_spec=pltpu.PrefetchScalarGridSpec(
            num_scalar_prefetch=0,
            grid=(N, n_th),
            in_specs=[
                # Padded image: depends only on n, stays VMEM-resident across hi.
                pl.BlockSpec((1, Hp, Wp, Cin), lambda n, hi: (n, 0, 0, 0)),
                # Reshaped weights: resident across the whole grid.
                pl.BlockSpec((K, Cout), lambda n, hi: (0, 0)),
            ],
            out_specs=pl.BlockSpec((1, Cout, TH * Wo), lambda n, hi: (n, 0, hi)),
            scratch_shapes=[pltpu.VMEM((TH * Wo, K), compute_dtype)],
        ),
        compiler_params=pltpu.CompilerParams(
            dimension_semantics=("parallel", "parallel"),
            vmem_limit_bytes=32 * 1024 * 1024,
        ),
    )(x_pad, w2d)

    # Free contiguous reshape: (N, Cout, Ho*Wo) -> (N, Cout, Ho, Wo) == NCHW.
    return out_flat.reshape(N, Cout, Ho, Wo)


if __name__ == "__main__":
    key = jax.random.PRNGKey(0)
    k_x, k_w = jax.random.split(key)

    # Small shapes consistent with the module's forward.
    N, Cin, H, W = 2, 4, 16, 16
    Cout, ksz = 8, 3
    stride, padding = 1, 1

    x = jax.random.normal(k_x, (N, Cin, H, W), jnp.float32)
    fan_in = Cin * ksz * ksz
    weight = jax.random.normal(k_w, (Cout, Cin, ksz, ksz), jnp.float32) / np.sqrt(fan_in)

    out = relu_conv2d_pallas(x, weight, stride=stride, padding=padding)
    out = jax.block_until_ready(out)

    # Reference with the same bf16 inputs the kernel feeds the MXU (f32 accumulate).
    xb = x.astype(jnp.bfloat16)
    wb = weight.astype(jnp.bfloat16)
    ref = jax.lax.conv_general_dilated(
        xb, wb,
        window_strides=(stride, stride),
        padding=((padding, padding), (padding, padding)),
        dimension_numbers=("NCHW", "OIHW", "NCHW"),
        preferred_element_type=jnp.float32,
    )
    ref = jnp.maximum(ref, 0.0).astype(jnp.float32)

    np.testing.assert_allclose(np.asarray(out), np.asarray(ref), rtol=1e-2, atol=1e-2)

    print("KERNEL_OK")
</pallas_src>

<mosaic_0001>
module attributes {stable_mosaic.version = 11 : i64} {
  func.func @_relu_conv_kernel(%arg0: i32, %arg1: i32, %arg2: memref<1x18x18x4xbf16, #tpu.memory_space<vmem>>, %arg3: memref<36x8xbf16, #tpu.memory_space<vmem>>, %arg4: memref<1x8x128xf32, #tpu.memory_space<vmem>>, %arg5: memref<128x36xbf16, #tpu.memory_space<vmem>>) attributes {dimension_semantics = [#tpu.dimension_semantics<parallel>, #tpu.dimension_semantics<parallel>], iteration_bounds = array<i64: 2, 2>, scalar_prefetch = 0 : i64, scratch_operands = 1 : i64, tpu.core_type = #tpu.core_type<tc>, window_params = [{transform_indices = @transform_0, window_bounds = array<i64: 1, 18, 18, 4>}, {pipeline_mode = #tpu.pipeline_mode<synchronous>, transform_indices = @transform_1, window_bounds = array<i64: 36, 8>}, {transform_indices = @transform_2, window_bounds = array<i64: 1, 8, 128>}]} {
    %c8_i32 = arith.constant 8 : i32
    %0 = arith.muli %arg1, %c8_i32 : i32
    %c0_i32 = arith.constant 0 : i32
    %1 = arith.addi %0, %c0_i32 : i32
    %c0 = arith.constant 0 : index
    %2 = arith.index_cast %1 : i32 to index
    %c0_0 = arith.constant 0 : index
    %c0_1 = arith.constant 0 : index
    %3 = vector.load %arg2[%c0, %2, %c0_0, %c0_1] : memref<1x18x18x4xbf16, #tpu.memory_space<vmem>>, vector<1x8x16x4xbf16>
    %4 = vector.shape_cast %3 : vector<1x8x16x4xbf16> to vector<8x16x4xbf16>
    %5 = vector.shape_cast %4 : vector<8x16x4xbf16> to vector<128x4xbf16>
    %c0_2 = arith.constant 0 : index
    %c0_3 = arith.constant 0 : index
    %6 = vector.load %arg5[%c0_2, %c0_3] : memref<128x36xbf16, #tpu.memory_space<vmem>>, vector<128x4xbf16>
    tpu.vector_store %arg5[%c0_2, %c0_3], %5 {strides = array<i32>} : memref<128x36xbf16, #tpu.memory_space<vmem>>, vector<128x4xbf16>,
    %c0_i32_4 = arith.constant 0 : i32
    %7 = arith.addi %0, %c0_i32_4 : i32
    %c0_5 = arith.constant 0 : index
    %8 = arith.index_cast %7 : i32 to index
    %c1 = arith.constant 1 : index
    %c0_6 = arith.constant 0 : index
    %9 = vector.load %arg2[%c0_5, %8, %c1, %c0_6] : memref<1x18x18x4xbf16, #tpu.memory_space<vmem>>, vector<1x8x16x4xbf16>
    %10 = vector.shape_cast %9 : vector<1x8x16x4xbf16> to vector<8x16x4xbf16>
    %11 = vector.shape_cast %10 : vector<8x16x4xbf16> to vector<128x4xbf16>
    %c0_7 = arith.constant 0 : index
    %c4 = arith.constant 4 : index
    %12 = vector.load %arg5[%c0_7, %c4] : memref<128x36xbf16, #tpu.memory_space<vmem>>, vector<128x4xbf16>
    tpu.vector_store %arg5[%c0_7, %c4], %11 {strides = array<i32>} : memref<128x36xbf16, #tpu.memory_space<vmem>>, vector<128x4xbf16>,
    %c0_i32_8 = arith.constant 0 : i32
    %13 = arith.addi %0, %c0_i32_8 : i32
    %c0_9 = arith.constant 0 : index
    %14 = arith.index_cast %13 : i32 to index
    %c2 = arith.constant 2 : index
    %c0_10 = arith.constant 0 : index
    %15 = vector.load %arg2[%c0_9, %14, %c2, %c0_10] : memref<1x18x18x4xbf16, #tpu.memory_space<vmem>>, vector<1x8x16x4xbf16>
    %16 = vector.shape_cast %15 : vector<1x8x16x4xbf16> to vector<8x16x4xbf16>
    %17 = vector.shape_cast %16 : vector<8x16x4xbf16> to vector<128x4xbf16>
    %c0_11 = arith.constant 0 : index
    %c8 = arith.constant 8 : index
    %18 = vector.load %arg5[%c0_11, %c8] : memref<128x36xbf16, #tpu.memory_space<vmem>>, vector<128x4xbf16>
    tpu.vector_store %arg5[%c0_11, %c8], %17 {strides = array<i32>} : memref<128x36xbf16, #tpu.memory_space<vmem>>, vector<128x4xbf16>,
    %c1_i32 = arith.constant 1 : i32
    %19 = arith.addi %0, %c1_i32 : i32
    %c0_12 = arith.constant 0 : index
    %20 = arith.index_cast %19 : i32 to index
    %c0_13 = arith.constant 0 : index
    %c0_14 = arith.constant 0 : index
    %21 = vector.load %arg2[%c0_12, %20, %c0_13, %c0_14] : memref<1x18x18x4xbf16, #tpu.memory_space<vmem>>, vector<1x8x16x4xbf16>
    %22 = vector.shape_cast %21 : vector<1x8x16x4xbf16> to vector<8x16x4xbf16>
    %23 = vector.shape_cast %22 : vector<8x16x4xbf16> to vector<128x4xbf16>
    %c0_15 = arith.constant 0 : index
    %c12 = arith.constant 12 : index
    %24 = vector.load %arg5[%c0_15, %c12] : memref<128x36xbf16, #tpu.memory_space<vmem>>, vector<128x4xbf16>
    tpu.vector_store %arg5[%c0_15, %c12], %23 {strides = array<i32>} : memref<128x36xbf16, #tpu.memory_space<vmem>>, vector<128x4xbf16>,
    %c1_i32_16 = arith.constant 1 : i32
    %25 = arith.addi %0, %c1_i32_16 : i32
    %c0_17 = arith.constant 0 : index
    %26 = arith.index_cast %25 : i32 to index
    %c1_18 = arith.constant 1 : index
    %c0_19 = arith.constant 0 : index
    %27 = vector.load %arg2[%c0_17, %26, %c1_18, %c0_19] : memref<1x18x18x4xbf16, #tpu.memory_space<vmem>>, vector<1x8x16x4xbf16>
    %28 = vector.shape_cast %27 : vector<1x8x16x4xbf16> to vector<8x16x4xbf16>
    %29 = vector.shape_cast %28 : vector<8x16x4xbf16> to vector<128x4xbf16>
    %c0_20 = arith.constant 0 : index
    %c16 = arith.constant 16 : index
    %30 = vector.load %arg5[%c0_20, %c16] : memref<128x36xbf16, #tpu.memory_space<vmem>>, vector<128x4xbf16>
    tpu.vector_store %arg5[%c0_20, %c16], %29 {strides = array<i32>} : memref<128x36xbf16, #tpu.memory_space<vmem>>, vector<128x4xbf16>,
    %c1_i32_21 = arith.constant 1 : i32
    %31 = arith.addi %0, %c1_i32_21 : i32
    %c0_22 = arith.constant 0 : index
    %32 = arith.index_cast %31 : i32 to index
    %c2_23 = arith.constant 2 : index
    %c0_24 = arith.constant 0 : index
    %33 = vector.load %arg2[%c0_22, %32, %c2_23, %c0_24] : memref<1x18x18x4xbf16, #tpu.memory_space<vmem>>, vector<1x8x16x4xbf16>
    %34 = vector.shape_cast %33 : vector<1x8x16x4xbf16> to vector<8x16x4xbf16>
    %35 = vector.shape_cast %34 : vector<8x16x4xbf16> to vector<128x4xbf16>
    %c0_25 = arith.constant 0 : index
    %c20 = arith.constant 20 : index
    %36 = vector.load %arg5[%c0_25, %c20] : memref<128x36xbf16, #tpu.memory_space<vmem>>, vector<128x4xbf16>
    tpu.vector_store %arg5[%c0_25, %c20], %35 {strides = array<i32>} : memref<128x36xbf16, #tpu.memory_space<vmem>>, vector<128x4xbf16>,
    %c2_i32 = arith.constant 2 : i32
    %37 = arith.addi %0, %c2_i32 : i32
    %c0_26 = arith.constant 0 : index
    %38 = arith.index_cast %37 : i32 to index
    %c0_27 = arith.constant 0 : index
    %c0_28 = arith.constant 0 : index
    %39 = vector.load %arg2[%c0_26, %38, %c0_27, %c0_28] : memref<1x18x18x4xbf16, #tpu.memory_space<vmem>>, vector<1x8x16x4xbf16>
    %40 = vector.shape_cast %39 : vector<1x8x16x4xbf16> to vector<8x16x4xbf16>
    %41 = vector.shape_cast %40 : vector<8x16x4xbf16> to vector<128x4xbf16>
    %c0_29 = arith.constant 0 : index
    %c24 = arith.constant 24 : index
    %42 = vector.load %arg5[%c0_29, %c24] : memref<128x36xbf16, #tpu.memory_space<vmem>>, vector<128x4xbf16>
    tpu.vector_store %arg5[%c0_29, %c24], %41 {strides = array<i32>} : memref<128x36xbf16, #tpu.memory_space<vmem>>, vector<128x4xbf16>,
    %c2_i32_30 = arith.constant 2 : i32
    %43 = arith.addi %0, %c2_i32_30 : i32
    %c0_31 = arith.constant 0 : index
    %44 = arith.index_cast %43 : i32 to index
    %c1_32 = arith.constant 1 : index
    %c0_33 = arith.constant 0 : index
    %45 = vector.load %arg2[%c0_31, %44, %c1_32, %c0_33] : memref<1x18x18x4xbf16, #tpu.memory_space<vmem>>, vector<1x8x16x4xbf16>
    %46 = vector.shape_cast %45 : vector<1x8x16x4xbf16> to vector<8x16x4xbf16>
    %47 = vector.shape_cast %46 : vector<8x16x4xbf16> to vector<128x4xbf16>
    %c0_34 = arith.constant 0 : index
    %c28 = arith.constant 28 : index
    %48 = vector.load %arg5[%c0_34, %c28] : memref<128x36xbf16, #tpu.memory_space<vmem>>, vector<128x4xbf16>
    tpu.vector_store %arg5[%c0_34, %c28], %47 {strides = array<i32>} : memref<128x36xbf16, #tpu.memory_space<vmem>>, vector<128x4xbf16>,
    %c2_i32_35 = arith.constant 2 : i32
    %49 = arith.addi %0, %c2_i32_35 : i32
    %c0_36 = arith.constant 0 : index
    %50 = arith.index_cast %49 : i32 to index
    %c2_37 = arith.constant 2 : index
    %c0_38 = arith.constant 0 : index
    %51 = vector.load %arg2[%c0_36, %50, %c2_37, %c0_38] : memref<1x18x18x4xbf16, #tpu.memory_space<vmem>>, vector<1x8x16x4xbf16>
    %52 = vector.shape_cast %51 : vector<1x8x16x4xbf16> to vector<8x16x4xbf16>
    %53 = vector.shape_cast %52 : vector<8x16x4xbf16> to vector<128x4xbf16>
    %c0_39 = arith.constant 0 : index
    %c32 = arith.constant 32 : index
    %54 = vector.load %arg5[%c0_39, %c32] : memref<128x36xbf16, #tpu.memory_space<vmem>>, vector<128x4xbf16>
    tpu.vector_store %arg5[%c0_39, %c32], %53 {strides = array<i32>} : memref<128x36xbf16, #tpu.memory_space<vmem>>, vector<128x4xbf16>,
    %c0_40 = arith.constant 0 : index
    %c0_41 = arith.constant 0 : index
    %55 = vector.load %arg5[%c0_40, %c0_41] : memref<128x36xbf16, #tpu.memory_space<vmem>>, vector<128x36xbf16>
    %c0_42 = arith.constant 0 : index
    %c0_43 = arith.constant 0 : index
    %56 = vector.load %arg3[%c0_42, %c0_43] : memref<36x8xbf16, #tpu.memory_space<vmem>>, vector<36x8xbf16>
    %cst = arith.constant dense<0.000000e+00> : vector<128x8xf32>
    %57 = tpu.matmul %55, %56, %cst {dimension_numbers = #tpu.dot_dimension_numbers<[1], [0], [0], [1], [0, 0, 1, 1], [], []>} : vector<128x36xbf16>, vector<36x8xbf16>, vector<128x8xf32> -> vector<128x8xf32>
    %cst_44 = arith.constant 0.000000e+00 : f32
    %58 = vector.broadcast %cst_44 : f32 to vector<128x8xf32>
    %59 = arith.maximumf %57, %58 : vector<128x8xf32>
    %60 = tpu.transpose %59, [1, 0] : vector<128x8xf32> -> vector<8x128xf32>
    %c0_45 = arith.constant 0 : index
    %c0_46 = arith.constant 0 : index
    %c0_47 = arith.constant 0 : index
    %61 = vector.load %arg4[%c0_45, %c0_46, %c0_47] : memref<1x8x128xf32, #tpu.memory_space<vmem>>, vector<1x8x128xf32>
    %62 = vector.shape_cast %61 : vector<1x8x128xf32> to vector<8x128xf32>
    %63 = vector.shape_cast %60 : vector<8x128xf32> to vector<1x8x128xf32>
    tpu.vector_store %arg4[%c0_45, %c0_46, %c0_47], %63 {strides = array<i32>} : memref<1x8x128xf32, #tpu.memory_space<vmem>>, vector<1x8x128xf32>,
    return
  }
  func.func @transform_0(%arg0: i32, %arg1: i32) -> (i32, i32, i32, i32) {
    %c0_i32 = arith.constant 0 : i32
    %c0_i32_0 = arith.constant 0 : i32
    %c0_i32_1 = arith.constant 0 : i32
    %c0_i32_2 = arith.constant 0 : i32
    return %arg0, %c0_i32, %c0_i32_0, %c0_i32_1 : i32, i32, i32, i32
  }
  func.func @transform_1(%arg0: i32, %arg1: i32) -> (i32, i32) {
    %c0_i32 = arith.constant 0 : i32
    %c0_i32_0 = arith.constant 0 : i32
    %c0_i32_1 = arith.constant 0 : i32
    return %c0_i32, %c0_i32_0 : i32, i32
  }
  func.func @transform_2(%arg0: i32, %arg1: i32) -> (i32, i32, i32) {
    %c0_i32 = arith.constant 0 : i32
    %c0_i32_0 = arith.constant 0 : i32
    return %arg0, %c0_i32, %arg1 : i32, i32, i32
  }
}

</mosaic_0001>

<bundles_post_ra>
// kernel: tpu_custom_call.1
= control target key start
LH: loop header
LB: loop body
LE: loop exit
PB: predicated region body
PF: predicated region fallthrough
CT: control target
= control target key end

     0   :  { %7 = vsyncpa [#allocation4], 0  ;;  %s3238_s0 = inlined_call_operand.vmem [shape: bf16[2,18,18,4], index: 0, kind: input, shape index: {}]   ;;  %s3239_s1 = inlined_call_operand.vmem [shape: bf16[36,8], index: 1, kind: input, shape index: {}]   ;;  %s3240_s2 = inlined_call_operand.hbm [shape: f32[2,8,256], index: 2, kind: output, shape index: {}]  }
   0x1   :  { %9 = vsyncpa [#allocation4 + $0x1], 0  ;;  %s2552_s9 = smov 0   ;;  %s2554_s10 = smov 0  }
   0x2   :  { %s2556_s11 = smov 0   ;;  %s2558_s12 = smov 0  }
   0x3   :  { %s2560_s13 = smov 0   ;;  %s2562_s14 = smov 0  }
   0x4   :  { %s2564_s15 = smov 0   ;;  %s2566_s16 = smov 0  }
   0x5 LB: > { %s2029_s17 = sadd.s32 4294967295, %s2526_s16   ;;  %s2030_s18 = sadd.s32 4294967294, %s2526_s16   ;;  %s2526_s16 = sphi %s2566_s16, %s15_s16   ;;  %s2522_s15 = sphi %s2564_s15, %s3253_s15   ;;  %s2518_s14 = sphi %s2562_s14, %s3252_s14   ;;  %s2514_s13 = sphi %s2560_s13, %s3251_s13   ;;  %s2510_s12 = sphi %s2558_s12, %s3250_s12   ;;  %s2506_s11 = sphi %s2556_s11, %s3249_s11   ;;  %s2502_s10 = sphi %s2554_s10, %s3248_s10   ;;  %s2498_s9 = sphi %s2552_s9, %s3247_s9  }
   0x6   : > { %s24_s19 = sadd.s32 1, %s2518_s14  ;;  %s27_s20 = sadd.s32 1, %s2522_s15 }
   0x7   : > { %p25_p0 = scmp.ge.s32.totalorder %s24_s19, 2  ;;  %p93_p1 = scmp.ne.s32.totalorder %s2506_s11, %s2502_s10 }
   0x8   : > { %p94_p2 = scmp.eq.s32.totalorder %s2029_s17, 3  ;;  %p99_p5 = scmp.ne.s32.totalorder %s2502_s10, %s2498_s9 }
   0x9   : > { %s3255_s19 = smov (%p25_p0, %s24_s19), 0  ;;  %s3257_s20 = smov (!%p25_p0, %s27_s20), %s2522_s15 }
   0xa   : > { %s79_s21 = ssub.s32 %s2518_s14, %s3255_s19  ;;  %p2603_p3 = por %p94_p2, %p93_p1 }
   0xb   : > { %p29_p4 = scmp.ge.s32.totalorder %s3257_s20, 2  ;;  %p100_p6 = scmp.eq.s32.totalorder %s2030_s18, 3 }
   0xc   : > { %p2033_p7 = scmp.ge.s32.totalorder %s2526_s16, 1  ;;  %p129_p9 = scmp.lt.s32.totalorder %s2526_s16, 5 }
   0xd   : > { %s3259_s20 = smov (%p29_p4, %s3257_s20), 0  ;;  %p2612_p8 = por %p100_p6, %p99_p5 }
   0xe   : > { %s78_s24 = ssub.s32 %s2522_s15, %s3259_s20  ;;  %s83_s25 = sadd.s32 1, %s2506_s11 }
   0xf   : > { %s80_s26 = sor.u32 %s79_s21, %s78_s24  ;;  %p130_p10 = pnand %p2033_p7, %p129_p9 }
  0x10   : > { %p81_p11 = scmp.eq.s32.totalorder %s80_s26, 0  ;;  %p151_p12 = scmp.lt.s32.totalorder (!%p130_p10), %s2514_s13, 1  ;;  %vm558_vm0 = vcmask (!%p130_p10), 1042432   ;;  %vm559_vm1 = vcmask (!%p130_p10), 1046532   ;;  %vm258_vm3 = vsmask.f32 (!%p130_p10), 3328 }
  0x11   : > { %133 = sbr.rel (%p130_p10) target bundleno = 618 (0x26a), region = 28  ;;  %vm2631_vm2 = vmor (!%p130_p10), %vm558_vm0, %vm559_vm1  ;;  %s2528_s7 = smov (!%p130_p10), 12   ;;  %vm259_vm4 = vsmask.f32 (!%p130_p10), 7440  ;;  %vm225_vm6 = vcmask (!%p130_p10), 31744   ;;  %vm501_vm7 = vcmask (!%p130_p10), 64544  }
  0x12   : > { %s2621_s27 = scalar_select %p81_p11, %s2506_s11, %s83_s25  }
  0x13   : > { %s2283_s29 = smul.u32 (!%p130_p10), 96, %s2510_s12  ;;  %s2529_s8 = smov (!%p130_p10), 24   ;;  %vm2676_vm5 = vmor (!%p130_p10), %vm258_vm3, %vm259_vm4  ;;  %vm665_vm8 = vcmask (!%p130_p10), 97344   ;;  %vm758_vm9 = vcmask (!%p130_p10), 130144   ;;  %vm1031_vm10 = vcmask (!%p130_p10), 162944   ;;  %vm1192_vm11 = vcmask (!%p130_p10), 195744  }
  0x14   : > { %s2530_s17 = smov (!%p130_p10), 20   ;;  %s2531_s18 = smov (!%p130_p10), 8   ;;  %vm1285_vm12 = vcmask (!%p130_p10), 228544   ;;  %vm1781_vm13 = vcmask (!%p130_p10), 1041408   ;;  %vm1558_vm14 = vcmask (!%p130_p10), 261344   ;;  %vm1719_vm15 = vcmask (!%p130_p10), 294144  }
  0x15   : > { %s2532_s21 = smov (!%p130_p10), 4   ;;  %s2533_s24 = smov (!%p130_p10), 16   ;;  %vm1756_vm0 = vcmask (!%p130_p10), 293888  }
  0x16   : > { %s2535_s3 = smov (!%p130_p10), 32  }
  0x18   : > { %s152_s28 = scalar_select %p151_p12, %s2514_s13, 1 }
  0x1a   : > { %s2325_s30 = smul.u32 216, %s152_s28 }
  0x1c   : > { %s155_s5 = scalar_lea.vmem %s3238_s0, %s2325_s30  ;;  %s2534_s30 = smov 28  }
  0x1d   : > { %s2629_s6 = scalar_lea.vmem %s155_s5, %s2283_s29 }
  0x1e   : > { %v2405_v1 = vld [vmem:[%s2629_s6 + $0x18] sm:$0xff]   ;;  %v2406_v2 = vld [vmem:[%s2629_s6 + $0xc] sm:$0xff]   ;;  %v2407_v3 = vld [vmem:[%s2629_s6 + $0x24] sm:$0xff]  }
  0x1f   : > { %736 = vrot.lane.b32.xlu1 %v2405_v1, %s2528_s7  ;;  %734 = vrot.lane.b32.xlu0 %v2406_v2, %s2528_s7  ;;  %v2408_v4 = vld [vmem:[%s2629_s6 + $0x18] sm:$0xff]   ;;  %v2129_v5 = vld [vmem:[%s2629_s6 + $0xc] sm:$0xe] }
  0x20   : > { %v2130_v6 = vld [vmem:[%s2629_s6 + $0x10] sm:$0xf]  ;;  %v2131_v7 = vld [vmem:[%s2629_s6 + $0x14] sm:$0x1]  ;;  %v2153_v8 = vrot.slane %v2129_v5, 9 }
  0x21   : > { %v1090_v9 = vrot.slane %v2130_v6, 5  ;;  %v1093_v10 = vrot.slane %v2131_v7, 5  ;;  %v510_v11 = vld [vmem:[%s2629_s6] sm:$0xe]  ;;  %v511_v12 = vld [vmem:[%s2629_s6 + $0x4] sm:$0xf] }
  0x22   : > { %v512_v13 = vld [vmem:[%s2629_s6 + $0x8] sm:$0x1]  ;;  %v2055_v14 = vrot.slane %v510_v11, 9  ;;  %v563_v17 = vrot.slane %v511_v12, 5  ;;  %v513_v19 = vld [vmem:[%s2629_s6 + $0xc] sm:$0xe] }
  0x23   : > { %1263 = vrot.lane.b32.xlu1 %v2407_v3, %s2529_s8  ;;  %1261 = vrot.lane.b32.xlu0 %v2408_v4, %s2529_s8  ;;  %v1091_v15 = vsel %vm2631_vm2, %v2153_v8, %v1090_v9  ;;  %v1092_v16 = vrot.slane %v1090_v9, 4  ;;  %v566_v18 = vrot.slane %v512_v13, 5  ;;  %v514_v20 = vld [vmem:[%s2629_s6 + $0x10] sm:$0xf]  ;;  %v515_v21 = vld [vmem:[%s2629_s6 + $0x14] sm:$0x1] }
  0x24   : > { %v2056_v22 = vrot.slane %v513_v19, 9  ;;  %v564_v24 = vsel %vm2631_vm2, %v2055_v14, %v563_v17  ;;  %v565_v25 = vrot.slane %v563_v17, 4  ;;  %v570_v26 = vrot.slane %v514_v20, 5  ;;  %v234_v27 = vld [vmem:[%s2629_s6] sm:$0xf] }
  0x25   : > { %v1094_v23 = vsel %vm2631_vm2, %v1092_v16, %v1093_v10  ;;  %v235_v28 = vld [vmem:[%s2629_s6 + $0x4] sm:$0xf]  ;;  %v573_v30 = vrot.slane %v515_v21, 5  ;;  %v236_v31 = vld [vmem:[%s2629_s6 + $0x8] sm:$0x1]  ;;  %v262_v32 = vshrl.u32 %v234_v27, 16 }
  0x26   : > { %v2161_v29 = vcombine.low %v1091_v15, %v1094_v23  ;;  %v265_v33 = vshll.u32 %v234_v27, 16  ;;  %v567_v34 = vsel %vm2631_vm2, %v565_v25, %v566_v18  ;;  %v571_v35 = vsel %vm2631_vm2, %v2056_v22, %v570_v26  ;;  %v2132_v38 = vld [vmem:[%s2629_s6 + $0x18] sm:$0xe]  ;;  %v2133_v39 = vld [vmem:[%s2629_s6 + $0x1c] sm:$0xf] }
  0x27   : > { %v572_v36 = vrot.slane %v570_v26, 4  ;;  %v271_v37 = vshll.u32 %v235_v28, 16  ;;  %v2063_v40 = vcombine.low %v564_v24, %v567_v34  ;;  %v264_v41 = vrot.slane %v262_v32, 4  ;;  %v2134_v44 = vld [vmem:[%s2629_s6 + $0x20] sm:$0x1] }
  0x28   : > { %1168 = vrot.lane.b32.xlu0 %v2161_v29, %s2530_s17  ;;  %v267_v42 = vrot.slane %v265_v33, 5  ;;  %v275_v43 = vshrl.u32 %v235_v28, 16  ;;  %v281_v47 = vshll.u32 %v236_v31, 16  ;;  %v2154_v48 = vrot.slane %v2132_v38, 9  ;;  %v237_v49 = vld [vmem:[%s2629_s6 + $0xc] sm:$0xf] }
  0x29   : > { %v574_v45 = vsel %vm2631_vm2, %v572_v36, %v573_v30  ;;  %v273_v46 = vrot.slane %v271_v37, 5  ;;  %641 = vrot.lane.b32.xlu1 %v2063_v40, %s2531_s18  ;;  %v1097_v53 = vrot.slane %v2133_v39, 5  ;;  %v238_v54 = vld [vmem:[%s2629_s6 + $0x10] sm:$0xf]  ;;  %v1100_v57 = vrot.slane %v2134_v44, 5 }
  0x2a   : > { %v2064_v50 = vcombine.low %v571_v35, %v574_v45  ;;  %v268_v51 = vor.u32 %v267_v42, %v264_v41  ;;  %v277_v52 = vrot.slane %v275_v43, 4  ;;  %v283_v56 = vrot.slane %v281_v47, 5  ;;  %v239_v58 = vld [vmem:[%s2629_s6 + $0x14] sm:$0x1]  ;;  %v2100_v6 = vld [vmem:[%s2629_s6 + $0x18] sm:$0xf] }
  0x2b   : > { %v286_v59 = vshrl.u32 %v237_v49, 16  ;;  %v289_v60 = vshll.u32 %v237_v49, 16  ;;  %v1098_v63 = vsel %vm2631_vm2, %v2154_v48, %v1097_v53  ;;  %v1099_v1 = vrot.slane %v1097_v53, 4  ;;  %v2101_v11 = vld [vmem:[%s2629_s6 + $0x1c] sm:$0xf] }
  0x2c   : > { %v269_v61 = vrot.slane %v268_v51, 4  ;;  %v278_v62 = vor.u32 %v277_v52, %v273_v46  ;;  %v295_v4 = vshll.u32 %v238_v54, 16  ;;  %v299_v5 = vshrl.u32 %v238_v54, 16  ;;  %v2102_v16 = vld [vmem:[%s2629_s6 + $0x20] sm:$0x1] }
  0x2d   : > { %v288_v2 = vrot.slane %v286_v59, 4  ;;  %v291_v3 = vrot.slane %v289_v60, 5  ;;  %643 = vrot.lane.b32.xlu1 %v2064_v50, %s2531_s18  ;;  %v1101_v9 = vsel %vm2631_vm2, %v1099_v1, %v1100_v57  ;;  %v305_v10 = vshll.u32 %v239_v58, 16  ;;  %v2097_v21 = vld [vmem:[%s2629_s6 + $0xc] sm:$0xf] }
  0x2e   : > { %v274_v7 = vsel %vm2676_vm5, %v269_v61, %v273_v46  ;;  %v279_v8 = vrot.slane %v278_v62, 4  ;;  %v2162_v12 = vcombine.low %v1098_v63, %v1101_v9  ;;  %v297_v14 = vrot.slane %v295_v4, 5  ;;  %v2098_v30 = vld [vmem:[%s2629_s6 + $0x10] sm:$0xf]  ;;  %v2099_v34 = vld [vmem:[%s2629_s6 + $0x14] sm:$0x1] }
  0x2f   : > { %v292_v13 = vor.u32 %v291_v3, %v288_v2  ;;  %v301_v15 = vrot.slane %v299_v5, 4  ;;  %v307_v18 = vrot.slane %v305_v10, 5  ;;  %v816_v19 = vshrl.u32 %v2100_v6, 16  ;;  %v2195_v40 = vld [vmem:[%s2629_s6 + $0x18] sm:$0xf] }
  0x30   : > { %v284_v17 = vsel %vm2676_vm5, %v279_v8, %v283_v56  ;;  %v819_v20 = vshll.u32 %v2100_v6, 16  ;;  %v825_v25 = vshll.u32 %v2101_v11, 16  ;;  %v829_v28 = vshrl.u32 %v2101_v11, 16  ;;  %v2196_v49 = vld [vmem:[%s2629_s6 + $0x1c] sm:$0xf] }
  0x31   : > { %v2047_v22 = vcombine.low %v274_v7, %v284_v17  ;;  %v293_v23 = vrot.slane %v292_v13, 4  ;;  %v302_v24 = vor.u32 %v301_v15, %v297_v14  ;;  %1170 = vrot.lane.b32.xlu1 %v2162_v12, %s2530_s17  ;;  %v818_v26 = vrot.slane %v816_v19, 4  ;;  %v2197_v58 = vld [vmem:[%s2629_s6 + $0x20] sm:$0x1]  ;;  %v2198_v1 = vld [vmem:[%s2629_s6 + $0x24] sm:$0xf] }
  0x32   : > { %v821_v27 = vrot.slane %v819_v20, 5  ;;  %v835_v29 = vshll.u32 %v2102_v16, 16  ;;  %v827_v33 = vrot.slane %v825_v25, 5  ;;  %v792_v35 = vshrl.u32 %v2097_v21, 16  ;;  %v2199_v6 = vld [vmem:[%s2629_s6 + $0x28] sm:$0xf] }
  0x33   : > { %477 = vrot.lane.b32.xlu0 %v2047_v22, %s2532_s21  ;;  %v298_v31 = vsel %vm2676_vm5, %v293_v23, %v297_v14  ;;  %v303_v32 = vrot.slane %v302_v24, 4  ;;  %v831_v37 = vrot.slane %v829_v28, 4  ;;  %v795_v39 = vshll.u32 %v2097_v21, 16  ;;  %v2200_v14 = vld [vmem:[%s2629_s6 + $0x2c] sm:$0x1]  ;;  %v2423_v22 = vld [vmem:[%s3239_s1] sm:$0xff]  }
  0x34   : > { %v822_v36 = vor.u32 %v821_v27, %v818_v26  ;;  %v837_v38 = vrot.slane %v835_v29, 5  ;;  %v794_v42 = vrot.slane %v792_v35, 4  ;;  %v801_v43 = vshll.u32 %v2098_v30, 16  ;;  %v2227_v16 = vld [vmem:[%s2629_s6 + $0x18] sm:$0xe]  ;;  %2295 = vmatprep.subr.bf16.mxu0 %v2423_v22  ;;  %2317 = vmatprep.subr.bf16.mxu1 %v2423_v22 }
  0x35   : > { %v308_v41 = vsel %vm2676_vm5, %v303_v32, %v307_v18  ;;  %v805_v44 = vshrl.u32 %v2098_v30, 16  ;;  %v832_v47 = vor.u32 %v831_v37, %v827_v33  ;;  %v797_v48 = vrot.slane %v795_v39, 5  ;;  %v2228_v21 = vld [vmem:[%s2629_s6 + $0x1c] sm:$0xf]  ;;  %v2229_v27 = vld [vmem:[%s2629_s6 + $0x20] sm:$0x1]  ;;  %2296 = vmatpush3.bf16.msra.mxu0 %v2423_v22  ;;  %2320 = vmatpush3.bf16.msra.mxu1 %v2423_v22 }
  0x36   : > { %v2048_v45 = vcombine.low %v298_v31, %v308_v41  ;;  %v823_v46 = vrot.slane %v822_v36, 4  ;;  %v803_v50 = vrot.slane %v801_v43, 5  ;;  %v811_v52 = vshll.u32 %v2099_v34, 16  ;;  %v240_v32 = vld [vmem:[%s2629_s6 + $0x18] sm:$0xf] }
  0x37   : > { %v807_v51 = vrot.slane %v805_v44, 4  ;;  %v1319_v53 = vshrl.u32 %v2195_v40, 16  ;;  %v833_v56 = vrot.slane %v832_v47, 4  ;;  %v798_v57 = vor.u32 %v797_v48, %v794_v42  ;;  %v241_v37 = vld [vmem:[%s2629_s6 + $0x1c] sm:$0xf] }
  0x38   : > { %479 = vrot.lane.b32.xlu0 %v2048_v45, %s2532_s21  ;;  %v828_v54 = vsel %vm2676_vm5, %v823_v46, %v827_v33  ;;  %v1322_v59 = vshll.u32 %v2195_v40, 16  ;;  %v813_v61 = vrot.slane %v811_v52, 5  ;;  %v1328_v63 = vshll.u32 %v2196_v49, 16  ;;  %v242_v42 = vld [vmem:[%s2629_s6 + $0x20] sm:$0x1] }
  0x39   : > { %v808_v60 = vor.u32 %v807_v51, %v803_v50  ;;  %v1321_v62 = vrot.slane %v1319_v53, 4  ;;  %v838_v2 = vsel %vm2676_vm5, %v833_v56, %v837_v38  ;;  %v799_v3 = vrot.slane %v798_v57, 4  ;;  %v2230_v43 = vld [vmem:[%s2629_s6 + $0x24] sm:$0xe]  ;;  %v2231_v52 = vld [vmem:[%s2629_s6 + $0x28] sm:$0xf] }
  0x3a   : > { %v1324_v4 = vrot.slane %v1322_v59, 5  ;;  %v1332_v5 = vshrl.u32 %v2196_v49, 16  ;;  %v2122_v7 = vcombine.low %v828_v54, %v838_v2  ;;  %v1330_v9 = vrot.slane %v1328_v63, 5  ;;  %v2425_v59 = vld [vmem:[%s3239_s1 + $0x8] sm:$0xff]   ;;  %v518_v22 = vld [vmem:[%s2629_s6 + $0x20] sm:$0x1] }
  0x3b   : > { %v809_v8 = vrot.slane %v808_v60, 4  ;;  %v1338_v10 = vshll.u32 %v2197_v58, 16  ;;  %v804_v11 = vsel %vm2676_vm5, %v799_v3, %v803_v50  ;;  %v1343_v15 = vshrl.u32 %v2198_v1, 16  ;;  %v2232_v58 = vld [vmem:[%s2629_s6 + $0x2c] sm:$0x1]  ;;  %2297 = vmatprep.subr.bf16.mxu0 %v2425_v59  ;;  %2318 = vmatprep.subr.bf16.mxu1 %v2425_v59 }
  0x3c   : > { %v1325_v12 = vor.u32 %v1324_v4, %v1321_v62  ;;  %v1334_v13 = vrot.slane %v1332_v5, 4  ;;  %1009 = vrot.lane.b32.xlu1 %v2122_v7, %s2533_s24  ;;  %v1346_v19 = vshll.u32 %v2198_v1, 16  ;;  %v1352_v20 = vshll.u32 %v2199_v6, 16  ;;  %v243_v1 = vld [vmem:[%s2629_s6 + $0x24] sm:$0xf]  ;;  %2298 = vmatpush3.bf16.msra.mxu0 %v2425_v59 }
  0x3d   : > { %v814_v17 = vsel %vm2676_vm5, %v809_v8, %v813_v61  ;;  %v1340_v18 = vrot.slane %v1338_v10, 5  ;;  %v1345_v26 = vrot.slane %v1343_v15, 4  ;;  %v1356_v30 = vshrl.u32 %v2199_v6, 16  ;;  %v244_v10 = vld [vmem:[%s2629_s6 + $0x28] sm:$0xf]  ;;  %2321 = vmatpush3.bf16.msra.mxu1 %v2425_v59 }
  0x3e   : > { %v2121_v23 = vcombine.low %v804_v11, %v814_v17  ;;  %v1326_v24 = vrot.slane %v1325_v12, 4  ;;  %v1335_v25 = vor.u32 %v1334_v13, %v1330_v9  ;;  %v1348_v28 = vrot.slane %v1346_v19, 5 }
  0x3f   : > { %v1354_v29 = vrot.slane %v1352_v20, 5  ;;  %v1362_v31 = vshll.u32 %v2200_v14, 16  ;;  %v2251_v35 = vrot.slane %v2227_v16, 9  ;;  %v1617_v36 = vrot.slane %v2228_v21, 5  ;;  %v245_v14 = vld [vmem:[%s2629_s6 + $0x2c] sm:$0x1] }
  0x40   : > { %1007 = vrot.lane.b32.xlu0 %v2121_v23, %s2533_s24  ;;  %v1331_v33 = vsel %vm2676_vm5, %v1326_v24, %v1330_v9  ;;  %v1336_v34 = vrot.slane %v1335_v25, 4  ;;  %v1349_v38 = vor.u32 %v1348_v28, %v1345_v26  ;;  %v1358_v39 = vrot.slane %v1356_v30, 4  ;;  %v516_v16 = vld [vmem:[%s2629_s6 + $0x18] sm:$0xe]  ;;  %v517_v21 = vld [vmem:[%s2629_s6 + $0x1c] sm:$0xf] }
  0x41   : > { %v1364_v40 = vrot.slane %v1362_v31, 5  ;;  %v1620_v41 = vrot.slane %v2229_v27, 5  ;;  %v1618_v45 = vsel %vm2631_vm2, %v2251_v35, %v1617_v36  ;;  %v1619_v46 = vrot.slane %v1617_v36, 4  ;;  %v519_v23 = vld [vmem:[%s2629_s6 + $0x24] sm:$0xe] }
  0x42   : > { %v1341_v44 = vsel %vm2676_vm5, %v1336_v34, %v1340_v18  ;;  %v310_v47 = vshrl.u32 %v240_v32, 16  ;;  %v1350_v49 = vrot.slane %v1349_v38, 4  ;;  %v1359_v50 = vor.u32 %v1358_v39, %v1354_v29  ;;  %v520_v28 = vld [vmem:[%s2629_s6 + $0x28] sm:$0xf]  ;;  %v2103_v34 = vld [vmem:[%s2629_s6 + $0x24] sm:$0xf] }
  0x43   : > { %v2219_v48 = vcombine.low %v1331_v33, %v1341_v44  ;;  %v313_v51 = vshll.u32 %v240_v32, 16  ;;  %v1621_v53 = vsel %vm2631_vm2, %v1619_v46, %v1620_v41  ;;  %v319_v56 = vshll.u32 %v241_v37, 16 }
  0x44   : > { %v312_v54 = vrot.slane %v310_v47, 4  ;;  %v323_v57 = vshrl.u32 %v241_v37, 16  ;;  %v1355_v60 = vsel %vm2676_vm5, %v1350_v49, %v1354_v29  ;;  %v1360_v61 = vrot.slane %v1359_v50, 4  ;;  %v521_v29 = vld [vmem:[%s2629_s6 + $0x2c] sm:$0x1] }
  0x45   : > { %1534 = vrot.lane.b32.xlu0 %v2219_v48, %s2534_s30  ;;  %v2259_v62 = vcombine.low %v1618_v45, %v1621_v53  ;;  %v315_v63 = vrot.slane %v313_v51, 5  ;;  %v321_v2 = vrot.slane %v319_v56, 5  ;;  %v329_v4 = vshll.u32 %v242_v42, 16  ;;  %v2104_v50 = vld [vmem:[%s2629_s6 + $0x28] sm:$0xf] }
  0x46   : > { %v325_v3 = vrot.slane %v323_v57, 4  ;;  %v2252_v5 = vrot.slane %v2230_v43, 9  ;;  %v1365_v6 = vsel %vm2676_vm5, %v1360_v61, %v1364_v40  ;;  %v1624_v8 = vrot.slane %v2231_v52, 5 }
  0x47   : > { %v316_v7 = vor.u32 %v315_v63, %v312_v54  ;;  %v1627_v9 = vrot.slane %v2232_v58, 5  ;;  %v2220_v11 = vcombine.low %v1355_v60, %v1365_v6  ;;  %v331_v13 = vrot.slane %v329_v4, 5  ;;  %v2105_v60 = vld [vmem:[%s2629_s6 + $0x2c] sm:$0x1]  ;;  %v2107_v4 = vld [vmem:[%s2629_s6 + $0x34] sm:$0xf] }
  0x48   : > { %v326_v12 = vor.u32 %v325_v3, %v321_v2  ;;  %v334_v15 = vshrl.u32 %v243_v1, 16  ;;  %v1625_v18 = vsel %vm2631_vm2, %v2252_v5, %v1624_v8  ;;  %v1626_v19 = vrot.slane %v1624_v8, 4  ;;  %v2106_v3 = vld [vmem:[%s2629_s6 + $0x30] sm:$0xf]  ;;  %v2409_v8 = vld [vmem:[%s2629_s6 + $0x24] sm:$0xff]  }
  0x49   : > { %1695 = vrot.lane.b32.xlu0 %v2259_v62, %s2535_s3  ;;  %v317_v17 = vrot.slane %v316_v7, 4  ;;  %v337_v20 = vshll.u32 %v243_v1, 16  ;;  %1536 = vrot.lane.b32.xlu1 %v2220_v11, %s2534_s30  ;;  %v343_v26 = vshll.u32 %v244_v10, 16  ;;  %v347_v27 = vshrl.u32 %v244_v10, 16  ;;  %v2108_v10 = vld [vmem:[%s2629_s6 + $0x38] sm:$0x1] }
  0x4a   : > { %v327_v24 = vrot.slane %v326_v12, 4  ;;  %v336_v25 = vrot.slane %v334_v15, 4  ;;  %v1628_v31 = vsel %vm2631_vm2, %v1626_v19, %v1627_v9  ;;  %v353_v33 = vshll.u32 %v245_v14, 16  ;;  %v2135_v11 = vld [vmem:[%s2629_s6 + $0x24] sm:$0xe] }
  0x4b   : > { %v322_v30 = vsel %vm2676_vm5, %v317_v17, %v321_v2  ;;  %v339_v32 = vrot.slane %v337_v20, 5  ;;  %v2260_v36 = vcombine.low %v1625_v18, %v1628_v31  ;;  %v345_v37 = vrot.slane %v343_v26, 5  ;;  %v2137_v17 = vld [vmem:[%s2629_s6 + $0x2c] sm:$0x1] }
  0x4c   : > { %v332_v35 = vsel %vm2676_vm5, %v327_v24, %v331_v13  ;;  %v349_v38 = vrot.slane %v347_v27, 4  ;;  %v355_v41 = vrot.slane %v353_v33, 5  ;;  %v2057_v42 = vrot.slane %v516_v16, 9  ;;  %v2136_v16 = vld [vmem:[%s2629_s6 + $0x28] sm:$0xf] }
  0x4d   : > { %v2049_v39 = vcombine.low %v322_v30, %v332_v35  ;;  %v340_v40 = vor.u32 %v339_v32, %v336_v25  ;;  %1697 = vrot.lane.b32.xlu0 %v2260_v36, %s2535_s3  ;;  %v577_v44 = vrot.slane %v517_v21, 5  ;;  %v580_v45 = vrot.slane %v518_v22, 5  ;;  %v2138_v22 = vld [vmem:[%s2629_s6 + $0x30] sm:$0xe]  ;;  %v2139_v27 = vld [vmem:[%s2629_s6 + $0x34] sm:$0xf] }
  0x4e   : > { %v350_v43 = vor.u32 %v349_v38, %v345_v37  ;;  %v2058_v46 = vrot.slane %v519_v23, 9  ;;  %v584_v48 = vrot.slane %v520_v28, 5  ;;  %v587_v49 = vrot.slane %v521_v29, 5  ;;  %v2140_v32 = vld [vmem:[%s2629_s6 + $0x38] sm:$0x1] }
  0x4f   : > { %481 = vrot.lane.b32.xlu1 %v2049_v39, %s2532_s21  ;;  %v341_v47 = vrot.slane %v340_v40, 4  ;;  %v840_v51 = vshrl.u32 %v2103_v34, 16  ;;  %v578_v53 = vsel %vm2631_vm2, %v2057_v42, %v577_v44  ;;  %v579_v54 = vrot.slane %v577_v44, 4 }
  0x50   : > { %v351_v52 = vrot.slane %v350_v43, 4  ;;  %v843_v56 = vshll.u32 %v2103_v34, 16  ;;  %v585_v58 = vsel %vm2631_vm2, %v2058_v46, %v584_v48  ;;  %v586_v59 = vrot.slane %v584_v48, 4  ;;  %v2201_v46 = vld [vmem:[%s2629_s6 + $0x30] sm:$0xf] }
  0x51   : > { %v346_v57 = vsel %vm2676_vm5, %v341_v47, %v345_v37  ;;  %v842_v61 = vrot.slane %v840_v51, 4  ;;  %v581_v63 = vsel %vm2631_vm2, %v579_v54, %v580_v45  ;;  %v849_v2 = vshll.u32 %v2104_v50, 16  ;;  %v2410_v37 = vld [vmem:[%s2629_s6 + $0x30] sm:$0xff]  }
  0x52   : > { %v356_v62 = vsel %vm2676_vm5, %v351_v52, %v355_v41  ;;  %v845_v1 = vrot.slane %v843_v56, 5  ;;  %v2065_v6 = vcombine.low %v578_v53, %v581_v63  ;;  %v588_v7 = vsel %vm2631_vm2, %v586_v59, %v587_v49  ;;  %v2202_v51 = vld [vmem:[%s2629_s6 + $0x34] sm:$0xf]  ;;  %v2205_v63 = vld [vmem:[%s2629_s6 + $0x40] sm:$0xf] }
  0x53   : > { %v2050_v5 = vcombine.low %v346_v57, %v356_v62  ;;  %v853_v9 = vshrl.u32 %v2104_v50, 16  ;;  %v2066_v12 = vcombine.low %v585_v58, %v588_v7  ;;  %v851_v14 = vrot.slane %v849_v2, 5  ;;  %v2203_v57 = vld [vmem:[%s2629_s6 + $0x38] sm:$0x1]  ;;  %v2204_v58 = vld [vmem:[%s2629_s6 + $0x3c] sm:$0xf] }
  0x54   : > { %v846_v13 = vor.u32 %v845_v1, %v842_v61  ;;  %v859_v15 = vshll.u32 %v2105_v60, 16  ;;  %645 = vrot.lane.b32.xlu0 %v2065_v6, %s2531_s18  ;;  %v864_v19 = vshrl.u32 %v2106_v3, 16  ;;  %v867_v20 = vshll.u32 %v2106_v3, 16  ;;  %v2206_v1 = vld [vmem:[%s2629_s6 + $0x44] sm:$0x1] }
  0x55   : > { %483 = vrot.lane.b32.xlu1 %v2050_v5, %s2532_s21  ;;  %v855_v18 = vrot.slane %v853_v9, 4  ;;  %v873_v21 = vshll.u32 %v2107_v4, 16  ;;  %v877_v25 = vshrl.u32 %v2107_v4, 16  ;;  %v883_v26 = vshll.u32 %v2108_v10, 16 }
  0x56   : > { %v847_v23 = vrot.slane %v846_v13, 4  ;;  %v861_v24 = vrot.slane %v859_v15, 5  ;;  %v866_v29 = vrot.slane %v864_v19, 4  ;;  %v869_v30 = vrot.slane %v867_v20, 5  ;;  %v2411_v15 = vld [vmem:[%s2629_s6 + $0x30] sm:$0xff]  }
  0x57   : > { %v856_v28 = vor.u32 %v855_v18, %v851_v14  ;;  %v875_v31 = vrot.slane %v873_v21, 5  ;;  %v879_v34 = vrot.slane %v877_v25, 4  ;;  %v885_v35 = vrot.slane %v883_v26, 5  ;;  %v2234_v20 = vld [vmem:[%s2629_s6 + $0x34] sm:$0xf] }
  0x58   : > { %v852_v33 = vsel %vm2676_vm5, %v847_v23, %v851_v14  ;;  %v2155_v36 = vrot.slane %v2135_v11, 9  ;;  %738 = vrot.lane.b32.xlu0 %v2409_v8, %s2528_s7  ;;  %v870_v39 = vor.u32 %v869_v30, %v866_v29  ;;  %v1104_v40 = vrot.slane %v2136_v16, 5  ;;  %v2233_v14 = vld [vmem:[%s2629_s6 + $0x30] sm:$0xe]  ;;  %v2235_v25 = vld [vmem:[%s2629_s6 + $0x38] sm:$0x1] }
  0x59   : > { %647 = vrot.lane.b32.xlu1 %v2066_v12, %s2531_s18  ;;  %v857_v38 = vrot.slane %v856_v28, 4  ;;  %v1107_v41 = vrot.slane %v2137_v17, 5  ;;  %v880_v42 = vor.u32 %v879_v34, %v875_v31  ;;  %v2156_v43 = vrot.slane %v2138_v22, 9  ;;  %v246_v30 = vld [vmem:[%s2629_s6 + $0x30] sm:$0xf] }
  0x5a   : > { %v1111_v44 = vrot.slane %v2139_v27, 5  ;;  %v1114_v45 = vrot.slane %v2140_v32, 5  ;;  %v871_v48 = vrot.slane %v870_v39, 4  ;;  %v1105_v49 = vsel %vm2631_vm2, %v2155_v36, %v1104_v40  ;;  %v2412_v36 = vld [vmem:[%s2629_s6 + $0x3c] sm:$0xff]  }
  0x5b   : > { %v862_v47 = vsel %vm2676_vm5, %v857_v38, %v861_v24  ;;  %v1106_v50 = vrot.slane %v1104_v40, 4  ;;  %v881_v53 = vrot.slane %v880_v42, 4  ;;  %v1367_v61 = vshrl.u32 %v2201_v46, 16 }
  0x5c   : > { %v2123_v52 = vcombine.low %v852_v33, %v862_v47  ;;  %v1112_v54 = vsel %vm2631_vm2, %v2156_v43, %v1111_v44  ;;  %v1113_v56 = vrot.slane %v1111_v44, 4  ;;  %v876_v59 = vsel %vm2676_vm5, %v871_v48, %v875_v31  ;;  %v248_v44 = vld [vmem:[%s2629_s6 + $0x38] sm:$0x1] }
  0x5d   : > { %740 = vrot.lane.b32.xlu1 %v2410_v37, %s2528_s7  ;;  %v1108_v60 = vsel %vm2631_vm2, %v1106_v50, %v1107_v41  ;;  %v1370_v62 = vshll.u32 %v2201_v46, 16  ;;  %v886_v2 = vsel %vm2676_vm5, %v881_v53, %v885_v35  ;;  %v1376_v5 = vshll.u32 %v2202_v51, 16  ;;  %v247_v35 = vld [vmem:[%s2629_s6 + $0x34] sm:$0xf]  ;;  %v2236_v46 = vld [vmem:[%s2629_s6 + $0x3c] sm:$0xe] }
  0x5e   : > { %1011 = vrot.lane.b32.xlu0 %v2123_v52, %s2533_s24  ;;  %v2163_v3 = vcombine.low %v1105_v49, %v1108_v60  ;;  %v1115_v4 = vsel %vm2631_vm2, %v1113_v56, %v1114_v45  ;;  %v2124_v6 = vcombine.low %v876_v59, %v886_v2  ;;  %v1369_v8 = vrot.slane %v1367_v61, 4 }
  0x5f   : > { %v2164_v7 = vcombine.low %v1112_v54, %v1115_v4  ;;  %v1372_v9 = vrot.slane %v1370_v62, 5  ;;  %v1378_v10 = vrot.slane %v1376_v5, 5  ;;  %v1380_v11 = vshrl.u32 %v2202_v51, 16  ;;  %v2237_v51 = vld [vmem:[%s2629_s6 + $0x40] sm:$0xf] }
  0x60   : > { %v1386_v12 = vshll.u32 %v2203_v57, 16  ;;  %v1391_v13 = vshrl.u32 %v2204_v58, 16  ;;  %v1394_v17 = vshll.u32 %v2204_v58, 16  ;;  %v1400_v18 = vshll.u32 %v2205_v63, 16  ;;  %v2238_v57 = vld [vmem:[%s2629_s6 + $0x44] sm:$0x1] }
  0x61   : > { %1013 = vrot.lane.b32.xlu1 %v2124_v6, %s2533_s24  ;;  %v1373_v16 = vor.u32 %v1372_v9, %v1369_v8  ;;  %v1404_v19 = vshrl.u32 %v2205_v63, 16  ;;  %v1382_v21 = vrot.slane %v1380_v11, 4  ;;  %v1410_v24 = vshll.u32 %v2206_v1, 16  ;;  %v249_v58 = vld [vmem:[%s2629_s6 + $0x3c] sm:$0xf] }
  0x62   : > { %1172 = vrot.lane.b32.xlu0 %v2163_v3, %s2530_s17  ;;  %v1388_v22 = vrot.slane %v1386_v12, 5  ;;  %v1393_v23 = vrot.slane %v1391_v13, 4  ;;  %v1396_v27 = vrot.slane %v1394_v17, 5  ;;  %v1402_v28 = vrot.slane %v1400_v18, 5  ;;  %v250_v63 = vld [vmem:[%s2629_s6 + $0x40] sm:$0xf] }
  0x63   : > { %v1374_v26 = vrot.slane %v1373_v16, 4  ;;  %v1406_v29 = vrot.slane %v1404_v19, 4  ;;  %v1383_v31 = vor.u32 %v1382_v21, %v1378_v10  ;;  %v1412_v32 = vrot.slane %v1410_v24, 5  ;;  %v251_v11 = vld [vmem:[%s2629_s6 + $0x44] sm:$0x1] }
  0x64   : > { %v2253_v33 = vrot.slane %v2233_v14, 9  ;;  %v1631_v34 = vrot.slane %v2234_v20, 5  ;;  %v1397_v38 = vor.u32 %v1396_v27, %v1393_v23  ;;  %v1634_v40 = vrot.slane %v2235_v25, 5  ;;  %v522_v14 = vld [vmem:[%s2629_s6 + $0x30] sm:$0xe] }
  0x65   : > { %1174 = vrot.lane.b32.xlu1 %v2164_v7, %s2530_s17  ;;  %v1379_v37 = vsel %vm2676_vm5, %v1374_v26, %v1378_v10  ;;  %v1407_v39 = vor.u32 %v1406_v29, %v1402_v28  ;;  %v1384_v41 = vrot.slane %v1383_v31, 4  ;;  %v358_v45 = vshrl.u32 %v246_v30, 16  ;;  %v523_v19 = vld [vmem:[%s2629_s6 + $0x34] sm:$0xf]  ;;  %v524_v24 = vld [vmem:[%s2629_s6 + $0x38] sm:$0x1] }
  0x66   : > { %1265 = vrot.lane.b32.xlu0 %v2411_v15, %s2529_s8  ;;  %v1632_v42 = vsel %vm2631_vm2, %v2253_v33, %v1631_v34  ;;  %v1633_v43 = vrot.slane %v1631_v34, 4  ;;  %v1398_v47 = vrot.slane %v1397_v38, 4  ;;  %v361_v49 = vshll.u32 %v246_v30, 16  ;;  %v525_v29 = vld [vmem:[%s2629_s6 + $0x3c] sm:$0xe] }
  0x67   : > { %v1408_v48 = vrot.slane %v1407_v39, 4  ;;  %v367_v50 = vshll.u32 %v247_v35, 16  ;;  %v1389_v52 = vsel %vm2676_vm5, %v1384_v41, %v1388_v22  ;;  %v360_v54 = vrot.slane %v358_v45, 4  ;;  %v526_v34 = vld [vmem:[%s2629_s6 + $0x40] sm:$0xf] }
  0x68   : > { %v1635_v53 = vsel %vm2631_vm2, %v1633_v43, %v1634_v40  ;;  %v371_v56 = vshrl.u32 %v247_v35, 16  ;;  %v2221_v59 = vcombine.low %v1379_v37, %v1389_v52  ;;  %v1403_v60 = vsel %vm2676_vm5, %v1398_v47, %v1402_v28  ;;  %v527_v35 = vld [vmem:[%s2629_s6 + $0x44] sm:$0x1] }
  0x69   : > { %1267 = vrot.lane.b32.xlu1 %v2412_v36, %s2529_s8  ;;  %v1413_v61 = vsel %vm2676_vm5, %v1408_v48, %v1412_v32  ;;  %v2261_v62 = vcombine.low %v1632_v42, %v1635_v53  ;;  %v363_v2 = vrot.slane %v361_v49, 5  ;;  %v369_v3 = vrot.slane %v367_v50, 5  ;;  %v2109_v36 = vld [vmem:[%s2629_s6 + $0x3c] sm:$0xf]  ;;  %v2110_v48 = vld [vmem:[%s2629_s6 + $0x40] sm:$0xf] }
  0x6a   : > { %v2222_v1 = vcombine.low %v1403_v60, %v1413_v61  ;;  %v373_v4 = vrot.slane %v371_v56, 4  ;;  %1538 = vrot.lane.b32.xlu0 %v2221_v59, %s2534_s30  ;;  %v377_v5 = vshll.u32 %v248_v44, 16  ;;  %v2254_v6 = vrot.slane %v2236_v46, 9  ;;  %v2111_v53 = vld [vmem:[%s2629_s6 + $0x44] sm:$0x1] }
  0x6b   : > { %v1638_v7 = vrot.slane %v2237_v51, 5  ;;  %v1641_v8 = vrot.slane %v2238_v57, 5  ;;  %v364_v9 = vor.u32 %v363_v2, %v360_v54  ;;  %v382_v12 = vshrl.u32 %v249_v58, 16  ;;  %v2112_v60 = vld [vmem:[%s2629_s6 + $0x48] sm:$0xf] }
  0x6c   : > { %v374_v10 = vor.u32 %v373_v4, %v369_v3  ;;  %v385_v13 = vshll.u32 %v249_v58, 16  ;;  %v379_v15 = vrot.slane %v377_v5, 5  ;;  %v391_v18 = vshll.u32 %v250_v63, 16  ;;  %v2113_v2 = vld [vmem:[%s2629_s6 + $0x4c] sm:$0xf] }
  0x6d   : > { %1540 = vrot.lane.b32.xlu1 %v2222_v1, %s2534_s30  ;;  %v1639_v16 = vsel %vm2631_vm2, %v2254_v6, %v1638_v7  ;;  %v1640_v17 = vrot.slane %v1638_v7, 4  ;;  %v365_v20 = vrot.slane %v364_v9, 4  ;;  %v384_v22 = vrot.slane %v382_v12, 4  ;;  %v2114_v7 = vld [vmem:[%s2629_s6 + $0x50] sm:$0x1] }
  0x6e   : > { %v375_v21 = vrot.slane %v374_v10, 4  ;;  %v387_v23 = vrot.slane %v385_v13, 5  ;;  %1699 = vrot.lane.b32.xlu0 %v2261_v62, %s2535_s3  ;;  %v393_v26 = vrot.slane %v391_v18, 5  ;;  %v395_v27 = vshrl.u32 %v250_v63, 16 }
  0x6f   : > { %v1642_v25 = vsel %vm2631_vm2, %v1640_v17, %v1641_v8  ;;  %v401_v28 = vshll.u32 %v251_v11, 16  ;;  %v370_v30 = vsel %vm2676_vm5, %v365_v20, %v369_v3  ;;  %v2059_v40 = vrot.slane %v522_v14, 9  ;;  %v2141_v8 = vld [vmem:[%s2629_s6 + $0x3c] sm:$0xe]  ;;  %v2142_v14 = vld [vmem:[%s2629_s6 + $0x40] sm:$0xf] }
  0x70   : > { %v380_v31 = vsel %vm2676_vm5, %v375_v21, %v379_v15  ;;  %v2262_v32 = vcombine.low %v1639_v16, %v1642_v25  ;;  %v388_v33 = vor.u32 %v387_v23, %v384_v22  ;;  %v397_v38 = vrot.slane %v395_v27, 4  ;;  %v2413_v11 = vld [vmem:[%s2629_s6 + $0x3c] sm:$0xff]   ;;  %v2143_v15 = vld [vmem:[%s2629_s6 + $0x44] sm:$0x1]  ;;  %v2144_v20 = vld [vmem:[%s2629_s6 + $0x48] sm:$0xe] }
  0x71   : > { %v2051_v37 = vcombine.low %v370_v30, %v380_v31  ;;  %v403_v39 = vrot.slane %v401_v28, 5  ;;  %v591_v42 = vrot.slane %v523_v19, 5  ;;  %v594_v43 = vrot.slane %v524_v24, 5  ;;  %v2145_v25 = vld [vmem:[%s2629_s6 + $0x4c] sm:$0xf] }
  0x72   : > { %v389_v41 = vrot.slane %v388_v33, 4  ;;  %v2060_v44 = vrot.slane %v525_v29, 9  ;;  %1701 = vrot.lane.b32.xlu0 %v2262_v32, %s2535_s3  ;;  %v398_v45 = vor.u32 %v397_v38, %v393_v26  ;;  %v598_v46 = vrot.slane %v526_v34, 5  ;;  %v2146_v30 = vld [vmem:[%s2629_s6 + $0x50] sm:$0x1] }
  0x73   : > { %485 = vrot.lane.b32.xlu1 %v2051_v37, %s2532_s21  ;;  %v601_v47 = vrot.slane %v527_v35, 5  ;;  %v888_v49 = vshrl.u32 %v2109_v36, 16  ;;  %v592_v51 = vsel %vm2631_vm2, %v2059_v40, %v591_v42  ;;  %v593_v52 = vrot.slane %v591_v42, 4  ;;  %v2207_v35 = vld [vmem:[%s2629_s6 + $0x48] sm:$0xf] }
  0x74   : > { %v394_v50 = vsel %vm2676_vm5, %v389_v41, %v393_v26  ;;  %v891_v54 = vshll.u32 %v2109_v36, 16  ;;  %v399_v56 = vrot.slane %v398_v45, 4  ;;  %v599_v57 = vsel %vm2631_vm2, %v2060_v44, %v598_v46  ;;  %v2208_v40 = vld [vmem:[%s2629_s6 + $0x4c] sm:$0xf] }
  0x75   : > { %v600_v58 = vrot.slane %v598_v46, 4  ;;  %v890_v59 = vrot.slane %v888_v49, 4  ;;  %v595_v61 = vsel %vm2631_vm2, %v593_v52, %v594_v43  ;;  %v897_v63 = vshll.u32 %v2110_v48, 16  ;;  %v2414_v41 = vld [vmem:[%s2629_s6 + $0x48] sm:$0xff]  }
  0x76   : > { %v893_v62 = vrot.slane %v891_v54, 5  ;;  %v901_v1 = vshrl.u32 %v2110_v48, 16  ;;  %v404_v3 = vsel %vm2676_vm5, %v399_v56, %v403_v39  ;;  %v2067_v4 = vcombine.low %v592_v51, %v595_v61 }
  0x77   : > { %v602_v5 = vsel %vm2631_vm2, %v600_v58, %v601_v47  ;;  %v907_v6 = vshll.u32 %v2111_v53, 16  ;;  %v2052_v9 = vcombine.low %v394_v50, %v404_v3  ;;  %v899_v13 = vrot.slane %v897_v63, 5 }
  0x78   : > { %v2068_v10 = vcombine.low %v599_v57, %v602_v5  ;;  %v894_v12 = vor.u32 %v893_v62, %v890_v59  ;;  %649 = vrot.lane.b32.xlu0 %v2067_v4, %s2531_s18  ;;  %v903_v16 = vrot.slane %v901_v1, 4  ;;  %v912_v18 = vshrl.u32 %v2112_v60, 16  ;;  %v2209_v57 = vld [vmem:[%s2629_s6 + $0x50] sm:$0x1] }
  0x79   : > { %v909_v17 = vrot.slane %v907_v6, 5  ;;  %v915_v19 = vshll.u32 %v2112_v60, 16  ;;  %487 = vrot.lane.b32.xlu1 %v2052_v9, %s2532_s21  ;;  %v921_v22 = vshll.u32 %v2113_v2, 16  ;;  %v925_v23 = vshrl.u32 %v2113_v2, 16  ;;  %v2210_v60 = vld [vmem:[%s2629_s6 + $0x54] sm:$0xf] }
  0x7a   : > { %v895_v21 = vrot.slane %v894_v12, 4  ;;  %v931_v24 = vshll.u32 %v2114_v7, 16  ;;  %v904_v26 = vor.u32 %v903_v16, %v899_v13  ;;  %v914_v27 = vrot.slane %v912_v18, 4  ;;  %v2211_v2 = vld [vmem:[%s2629_s6 + $0x58] sm:$0xf] }
  0x7b   : > { %v917_v28 = vrot.slane %v915_v19, 5  ;;  %v2157_v29 = vrot.slane %v2141_v8, 9  ;;  %v923_v32 = vrot.slane %v921_v22, 5  ;;  %v927_v33 = vrot.slane %v925_v23, 4  ;;  %v2212_v7 = vld [vmem:[%s2629_s6 + $0x5c] sm:$0x1] }
  0x7c   : > { %v900_v31 = vsel %vm2676_vm5, %v895_v21, %v899_v13  ;;  %v933_v34 = vrot.slane %v931_v24, 5  ;;  %742 = vrot.lane.b32.xlu0 %v2413_v11, %s2528_s7  ;;  %v905_v36 = vrot.slane %v904_v26, 4  ;;  %v1118_v38 = vrot.slane %v2142_v14, 5  ;;  %v2239_v12 = vld [vmem:[%s2629_s6 + $0x48] sm:$0xe] }
  0x7d   : > { %v918_v37 = vor.u32 %v917_v28, %v914_v27  ;;  %v1121_v39 = vrot.slane %v2143_v15, 5  ;;  %651 = vrot.lane.b32.xlu1 %v2068_v10, %s2531_s18  ;;  %v928_v42 = vor.u32 %v927_v33, %v923_v32  ;;  %v2158_v43 = vrot.slane %v2144_v20, 9  ;;  %v2415_v13 = vld [vmem:[%s2629_s6 + $0x48] sm:$0xff]   ;;  %v2241_v23 = vld [vmem:[%s2629_s6 + $0x50] sm:$0x1] }
  0x7e   : > { %v1125_v44 = vrot.slane %v2145_v25, 5  ;;  %v1128_v45 = vrot.slane %v2146_v30, 5  ;;  %v910_v46 = vsel %vm2676_vm5, %v905_v36, %v909_v17  ;;  %v1119_v48 = vsel %vm2631_vm2, %v2157_v29, %v1118_v38  ;;  %v2240_v18 = vld [vmem:[%s2629_s6 + $0x4c] sm:$0xf]  ;;  %v252_v28 = vld [vmem:[%s2629_s6 + $0x48] sm:$0xf] }
  0x7f   : > { %v919_v47 = vrot.slane %v918_v37, 4  ;;  %v1120_v49 = vrot.slane %v1118_v38, 4  ;;  %v2125_v50 = vcombine.low %v900_v31, %v910_v46  ;;  %v929_v51 = vrot.slane %v928_v42, 4  ;;  %v253_v33 = vld [vmem:[%s2629_s6 + $0x4c] sm:$0xf]  ;;  %v2416_v38 = vld [vmem:[%s2629_s6 + $0x54] sm:$0xff]  }
  0x80   : > { %v1126_v52 = vsel %vm2631_vm2, %v2158_v43, %v1125_v44  ;;  %v1127_v53 = vrot.slane %v1125_v44, 4  ;;  %v1415_v58 = vshrl.u32 %v2207_v35, 16  ;;  %v1418_v59 = vshll.u32 %v2207_v35, 16  ;;  %v254_v42 = vld [vmem:[%s2629_s6 + $0x50] sm:$0x1] }
  0x81   : > { %v924_v54 = vsel %vm2676_vm5, %v919_v47, %v923_v32  ;;  %v1122_v56 = vsel %vm2631_vm2, %v1120_v49, %v1121_v39  ;;  %744 = vrot.lane.b32.xlu1 %v2414_v41, %s2528_s7  ;;  %1015 = vrot.lane.b32.xlu0 %v2125_v50, %s2533_s24  ;;  %v934_v61 = vsel %vm2676_vm5, %v929_v51, %v933_v34  ;;  %v1424_v1 = vshll.u32 %v2208_v40, 16  ;;  %v2242_v44 = vld [vmem:[%s2629_s6 + $0x54] sm:$0xe] }
  0x82   : > { %v2165_v62 = vcombine.low %v1119_v48, %v1122_v56  ;;  %v1129_v63 = vsel %vm2631_vm2, %v1127_v53, %v1128_v45  ;;  %v2126_v3 = vcombine.low %v924_v54, %v934_v61  ;;  %v1417_v5 = vrot.slane %v1415_v58, 4  ;;  %v2243_v53 = vld [vmem:[%s2629_s6 + $0x58] sm:$0xf]  ;;  %v2244_v54 = vld [vmem:[%s2629_s6 + $0x5c] sm:$0x1] }
  0x83   : > { %v2166_v4 = vcombine.low %v1126_v52, %v1129_v63  ;;  %v1420_v6 = vrot.slane %v1418_v59, 5  ;;  %v1426_v8 = vrot.slane %v1424_v1, 5  ;;  %v1428_v9 = vshrl.u32 %v2208_v40, 16 }
  0x84   : > { %v1434_v10 = vshll.u32 %v2209_v57, 16  ;;  %v1439_v11 = vshrl.u32 %v2210_v60, 16  ;;  %v1442_v15 = vshll.u32 %v2210_v60, 16  ;;  %v1448_v16 = vshll.u32 %v2211_v2, 16  ;;  %v255_v60 = vld [vmem:[%s2629_s6 + $0x54] sm:$0xf] }
  0x85   : > { %v1421_v14 = vor.u32 %v1420_v6, %v1417_v5  ;;  %v1452_v17 = vshrl.u32 %v2211_v2, 16  ;;  %1017 = vrot.lane.b32.xlu1 %v2126_v3, %s2533_s24  ;;  %1176 = vrot.lane.b32.xlu0 %v2165_v62, %s2530_s17  ;;  %v1430_v19 = vrot.slane %v1428_v9, 4  ;;  %v1458_v22 = vshll.u32 %v2212_v7, 16  ;;  %v256_v2 = vld [vmem:[%s2629_s6 + $0x58] sm:$0xf] }
  0x86   : > { %v1436_v20 = vrot.slane %v1434_v10, 5  ;;  %v1441_v21 = vrot.slane %v1439_v11, 4  ;;  %v1444_v25 = vrot.slane %v1442_v15, 5  ;;  %v1450_v26 = vrot.slane %v1448_v16, 5  ;;  %v257_v9 = vld [vmem:[%s2629_s6 + $0x5c] sm:$0x1] }
  0x87   : > { %v1422_v24 = vrot.slane %v1421_v14, 4  ;;  %v1454_v27 = vrot.slane %v1452_v17, 4  ;;  %v1431_v29 = vor.u32 %v1430_v19, %v1426_v8  ;;  %v1460_v30 = vrot.slane %v1458_v22, 5  ;;  %v529_v17 = vld [vmem:[%s2629_s6 + $0x4c] sm:$0xf] }
  0x88   : > { %v2255_v31 = vrot.slane %v2239_v12, 9  ;;  %v1645_v32 = vrot.slane %v2240_v18, 5  ;;  %v1445_v35 = vor.u32 %v1444_v25, %v1441_v21  ;;  %v1648_v37 = vrot.slane %v2241_v23, 5  ;;  %v528_v12 = vld [vmem:[%s2629_s6 + $0x48] sm:$0xe] }
  0x89   : > { %v1427_v34 = vsel %vm2676_vm5, %v1422_v24, %v1426_v8  ;;  %v1455_v36 = vor.u32 %v1454_v27, %v1450_v26  ;;  %1178 = vrot.lane.b32.xlu1 %v2166_v4, %s2530_s17  ;;  %1269 = vrot.lane.b32.xlu0 %v2415_v13, %s2529_s8  ;;  %v1432_v39 = vrot.slane %v1431_v29, 4  ;;  %v406_v43 = vshrl.u32 %v252_v28, 16  ;;  %v530_v18 = vld [vmem:[%s2629_s6 + $0x50] sm:$0x1]  ;;  %v531_v19 = vld [vmem:[%s2629_s6 + $0x54] sm:$0xe] }
  0x8a   : > { %v1646_v40 = vsel %vm2631_vm2, %v2255_v31, %v1645_v32  ;;  %v1647_v41 = vrot.slane %v1645_v32, 4  ;;  %v1446_v45 = vrot.slane %v1445_v35, 4  ;;  %v409_v47 = vshll.u32 %v252_v28, 16  ;;  %v532_v24 = vld [vmem:[%s2629_s6 + $0x58] sm:$0xf] }
  0x8b   : > { %v1456_v46 = vrot.slane %v1455_v36, 4  ;;  %v415_v48 = vshll.u32 %v253_v33, 16  ;;  %v1437_v49 = vsel %vm2676_vm5, %v1432_v39, %v1436_v20  ;;  %v408_v51 = vrot.slane %v406_v43, 4  ;;  %v533_v25 = vld [vmem:[%s2629_s6 + $0x5c] sm:$0x1] }
  0x8c   : > { %v1649_v50 = vsel %vm2631_vm2, %v1647_v41, %v1648_v37  ;;  %v419_v52 = vshrl.u32 %v253_v33, 16  ;;  %v2223_v56 = vcombine.low %v1427_v34, %v1437_v49  ;;  %v1451_v57 = vsel %vm2676_vm5, %v1446_v45, %v1450_v26  ;;  %v2116_v41 = vld [vmem:[%s2629_s6 + $0x58] sm:$0xf] }
  0x8d   : > { %v1461_v58 = vsel %vm2676_vm5, %v1456_v46, %v1460_v30  ;;  %v2263_v59 = vcombine.low %v1646_v40, %v1649_v50  ;;  %1271 = vrot.lane.b32.xlu1 %v2416_v38, %s2529_s8  ;;  %v411_v62 = vrot.slane %v409_v47, 5  ;;  %v417_v63 = vrot.slane %v415_v48, 5  ;;  %v2115_v30 = vld [vmem:[%s2629_s6 + $0x54] sm:$0xf]  ;;  %v2117_v46 = vld [vmem:[%s2629_s6 + $0x5c] sm:$0x1] }
  0x8e   : > { %v2224_v61 = vcombine.low %v1451_v57, %v1461_v58  ;;  %v421_v1 = vrot.slane %v419_v52, 4  ;;  %1542 = vrot.lane.b32.xlu0 %v2223_v56, %s2534_s30  ;;  %v425_v3 = vshll.u32 %v254_v42, 16  ;;  %v2256_v4 = vrot.slane %v2242_v44, 9  ;;  %v2118_v56 = vld [vmem:[%s2629_s6 + $0x60] sm:$0xf] }
  0x8f   : > { %v1652_v5 = vrot.slane %v2243_v53, 5  ;;  %v1655_v6 = vrot.slane %v2244_v54, 5  ;;  %v412_v7 = vor.u32 %v411_v62, %v408_v51  ;;  %v430_v10 = vshrl.u32 %v255_v60, 16  ;;  %v2120_v62 = vld [vmem:[%s2629_s6 + $0x68] sm:$0x1] }
  0x90   : > { %v422_v8 = vor.u32 %v421_v1, %v417_v63  ;;  %v433_v11 = vshll.u32 %v255_v60, 16  ;;  %v427_v13 = vrot.slane %v425_v3, 5  ;;  %v439_v16 = vshll.u32 %v256_v2, 16 }
  0x91   : > { %v1653_v14 = vsel %vm2631_vm2, %v2256_v4, %v1652_v5  ;;  %v1654_v15 = vrot.slane %v1652_v5, 4  ;;  %1544 = vrot.lane.b32.xlu1 %v2224_v61, %s2534_s30  ;;  %v413_v20 = vrot.slane %v412_v7, 4  ;;  %v432_v22 = vrot.slane %v430_v10, 4  ;;  %v2975_v35 = vpop.permute.xlu1 %736  ;;  %v2977_v36 = vpop.permute.xlu0 %734  ;;  %v2119_v61 = vld [vmem:[%s2629_s6 + $0x64] sm:$0xf] }
  0x92   : > { %v423_v21 = vrot.slane %v422_v8, 4  ;;  %v435_v23 = vrot.slane %v433_v11, 5  ;;  %1703 = vrot.lane.b32.xlu0 %v2263_v59, %s2535_s3  ;;  %v441_v27 = vrot.slane %v439_v16, 5  ;;  %v443_v28 = vshrl.u32 %v256_v2, 16  ;;  %v2147_v4 = vld [vmem:[%s2629_s6 + $0x54] sm:$0xe] }
  0x93   : > { %v1656_v26 = vsel %vm2631_vm2, %v1654_v15, %v1655_v6  ;;  %v449_v29 = vshll.u32 %v257_v9, 16  ;;  %v418_v31 = vsel %vm2676_vm5, %v413_v20, %v417_v63  ;;  %v2061_v40 = vrot.slane %v528_v12, 9  ;;  %v2148_v16 = vld [vmem:[%s2629_s6 + $0x58] sm:$0xf] }
  0x94   : > { %v428_v32 = vsel %vm2676_vm5, %v423_v21, %v427_v13  ;;  %v2264_v33 = vcombine.low %v1653_v14, %v1656_v26  ;;  %v436_v34 = vor.u32 %v435_v23, %v432_v22  ;;  %v445_v38 = vrot.slane %v443_v28, 4  ;;  %v2417_v13 = vld [vmem:[%s2629_s6 + $0x54] sm:$0xff]   ;;  %v2150_v22 = vld [vmem:[%s2629_s6 + $0x60] sm:$0xe]  ;;  %v2151_v23 = vld [vmem:[%s2629_s6 + $0x64] sm:$0xf] }
  0x95   : > { %v2053_v37 = vcombine.low %v418_v31, %v428_v32  ;;  %v451_v39 = vrot.slane %v449_v29, 5  ;;  %v605_v43 = vrot.slane %v529_v17, 5  ;;  %v608_v44 = vrot.slane %v530_v18, 5  ;;  %v2995_v5 = vpop.permute.xlu1 %1263  ;;  %v2997_v6 = vpop.permute.xlu0 %1261  ;;  %v2149_v17 = vld [vmem:[%s2629_s6 + $0x5c] sm:$0x1] }
  0x96   : > { %v437_v42 = vrot.slane %v436_v34, 4  ;;  %v2062_v45 = vrot.slane %v531_v19, 9  ;;  %1705 = vrot.lane.b32.xlu0 %v2264_v33, %s2535_s3  ;;  %v446_v47 = vor.u32 %v445_v38, %v441_v27  ;;  %v612_v48 = vrot.slane %v532_v24, 5  ;;  %v2152_v24 = vld [vmem:[%s2629_s6 + $0x68] sm:$0x1] }
  0x97   : > { %489 = vrot.lane.b32.xlu1 %v2053_v37, %s2532_s21  ;;  %v615_v49 = vrot.slane %v533_v25, 5  ;;  %v936_v50 = vshrl.u32 %v2115_v30, 16  ;;  %v606_v52 = vsel %vm2631_vm2, %v2061_v40, %v605_v43  ;;  %v607_v53 = vrot.slane %v605_v43, 4 }
  0x98   : > { %v442_v51 = vsel %vm2676_vm5, %v437_v42, %v441_v27  ;;  %v939_v54 = vshll.u32 %v2115_v30, 16  ;;  %v447_v57 = vrot.slane %v446_v47, 4  ;;  %v613_v58 = vsel %vm2631_vm2, %v2062_v45, %v612_v48  ;;  %v2418_v45 = vld [vmem:[%s2629_s6 + $0x60] sm:$0xff]  }
  0x99   : > { %v614_v59 = vrot.slane %v612_v48, 4  ;;  %v938_v60 = vrot.slane %v936_v50, 4  ;;  %v609_v63 = vsel %vm2631_vm2, %v607_v53, %v608_v44  ;;  %v945_v2 = vshll.u32 %v2116_v41, 16  ;;  %v2213_v50 = vld [vmem:[%s2629_s6 + $0x60] sm:$0xf] }
  0x9a   : > { %v941_v1 = vrot.slane %v939_v54, 5  ;;  %v949_v3 = vshrl.u32 %v2116_v41, 16  ;;  %v452_v7 = vsel %vm2676_vm5, %v447_v57, %v451_v39  ;;  %v2069_v8 = vcombine.low %v606_v52, %v609_v63  ;;  %v3013_v39 = vpop.permute.xlu0 %1168  ;;  %v2215_v63 = vld [vmem:[%s2629_s6 + $0x68] sm:$0x1] }
  0x9b   : > { %v616_v9 = vsel %vm2631_vm2, %v614_v59, %v615_v49  ;;  %v955_v10 = vshll.u32 %v2117_v46, 16  ;;  %v2054_v11 = vcombine.low %v442_v51, %v452_v7  ;;  %v947_v15 = vrot.slane %v945_v2, 5  ;;  %v3015_v40 = vpop.permute.xlu1 %641 }
  0x9c   : > { %v2070_v12 = vcombine.low %v613_v58, %v616_v9  ;;  %v942_v14 = vor.u32 %v941_v1, %v938_v60  ;;  %653 = vrot.lane.b32.xlu0 %v2069_v8, %s2531_s18  ;;  %v951_v18 = vrot.slane %v949_v3, 4  ;;  %v960_v20 = vshrl.u32 %v2118_v56, 16  ;;  %v2216_v3 = vld [vmem:[%s2629_s6 + $0x6c] sm:$0xf] }
  0x9d   : > { %v957_v19 = vrot.slane %v955_v10, 5  ;;  %v963_v21 = vshll.u32 %v2118_v56, 16  ;;  %491 = vrot.lane.b32.xlu1 %v2054_v11, %s2532_s21  ;;  %v969_v26 = vshll.u32 %v2119_v61, 16  ;;  %v973_v27 = vshrl.u32 %v2119_v61, 16  ;;  %v2214_v56 = vld [vmem:[%s2629_s6 + $0x64] sm:$0xf] }
  0x9e   : > { %v943_v25 = vrot.slane %v942_v14, 4  ;;  %v979_v28 = vshll.u32 %v2120_v62, 16  ;;  %v952_v29 = vor.u32 %v951_v18, %v947_v15  ;;  %v962_v30 = vrot.slane %v960_v20, 4  ;;  %v2217_v10 = vld [vmem:[%s2629_s6 + $0x70] sm:$0xf] }
  0x9f   : > { %v965_v31 = vrot.slane %v963_v21, 5  ;;  %v2159_v32 = vrot.slane %v2147_v4, 9  ;;  %v971_v34 = vrot.slane %v969_v26, 5  ;;  %v975_v37 = vrot.slane %v973_v27, 4  ;;  %v3043_v11 = vpop.permute.xlu1 %643  ;;  %v2245_v18 = vld [vmem:[%s2629_s6 + $0x60] sm:$0xe] }
  0xa0   : > { %v948_v33 = vsel %vm2676_vm5, %v943_v25, %v947_v15  ;;  %v981_v38 = vrot.slane %v979_v28, 5  ;;  %746 = vrot.lane.b32.xlu0 %v2417_v13, %s2528_s7  ;;  %v953_v41 = vrot.slane %v952_v29, 4  ;;  %v1132_v43 = vrot.slane %v2148_v16, 5  ;;  %v2247_v29 = vld [vmem:[%s2629_s6 + $0x68] sm:$0x1] }
  0xa1   : > { %v966_v42 = vor.u32 %v965_v31, %v962_v30  ;;  %v1135_v44 = vrot.slane %v2149_v17, 5  ;;  %655 = vrot.lane.b32.xlu1 %v2070_v12, %s2531_s18  ;;  %v976_v46 = vor.u32 %v975_v37, %v971_v34  ;;  %v2160_v47 = vrot.slane %v2150_v22, 9  ;;  %v2218_v17 = vld [vmem:[%s2629_s6 + $0x74] sm:$0x1] }
  0xa2   : > { %v1139_v48 = vrot.slane %v2151_v23, 5  ;;  %v1142_v49 = vrot.slane %v2152_v24, 5  ;;  %v958_v51 = vsel %vm2676_vm5, %v953_v41, %v957_v19  ;;  %v1133_v53 = vsel %vm2631_vm2, %v2159_v32, %v1132_v43  ;;  %v2246_v23 = vld [vmem:[%s2629_s6 + $0x64] sm:$0xf] }
  0xa3   : > { %v967_v52 = vrot.slane %v966_v42, 4  ;;  %v1134_v54 = vrot.slane %v1132_v43, 4  ;;  %v2127_v57 = vcombine.low %v948_v33, %v958_v51  ;;  %v977_v58 = vrot.slane %v976_v46, 4  ;;  %v2419_v24 = vld [vmem:[%s2629_s6 + $0x60] sm:$0xff]   ;;  %v2249_v43 = vld [vmem:[%s2629_s6 + $0x70] sm:$0xf] }
  0xa4   : > { %v3028_v59 = vsel %vm2631_vm2, %v2160_v47, %v1139_v48  ;;  %v1141_v60 = vrot.slane %v1139_v48, 4  ;;  %v1463_v1 = vshrl.u32 %v2213_v50, 16  ;;  %v1466_v2 = vshll.u32 %v2213_v50, 16  ;;  %v2424_v46 = vld [vmem:[%s2629_s6 + $0x18] sm:$0xff]   ;;  %v2426_v47 = vld [vmem:[%s2629_s6 + $0x24] sm:$0xff]  }
  0xa5   : > { %v972_v61 = vsel %vm2676_vm5, %v967_v52, %v971_v34  ;;  %v1136_v62 = vsel %vm2631_vm2, %v1134_v54, %v1135_v44  ;;  %748 = vrot.lane.b32.xlu1 %v2418_v45, %s2528_s7  ;;  %1019 = vrot.lane.b32.xlu0 %v2127_v57, %s2533_s24  ;;  %v982_v4 = vsel %vm2676_vm5, %v977_v58, %v981_v38  ;;  %v1472_v9 = vshll.u32 %v2214_v56, 16  ;;  %v3045_v12 = vpop.permute.xlu0 %477  ;;  %v3056_v34 = vld [vmem:[%s2629_s6 + $0x6c] sm:$0xe]  ;;  %v2421_v44 = vld [vmem:[%s2629_s6] sm:$0xff]  }
  0xa6   : > { %v2167_v7 = vcombine.low %v1133_v53, %v1136_v62  ;;  %v1143_v8 = vsel %vm2631_vm2, %v1141_v60, %v1142_v49  ;;  %v2128_v13 = vcombine.low %v972_v61, %v982_v4  ;;  %v1465_v15 = vrot.slane %v1463_v1, 4  ;;  %v2422_v45 = vld [vmem:[%s2629_s6 + $0xc] sm:$0xff]   ;;  %v2250_v52 = vld [vmem:[%s2629_s6 + $0x74] sm:$0x1]  ;;  %v3064_v53 = vpop.permute.xlu1 %1170  ;;  %v2429_v61 = vld [vmem:[%s2629_s6 + $0x3c] sm:$0xff]   ;;  %226 = vst.msk [vmem:[#allocation2] sm:$0xff] %vm225_vm6, %v2421_v44 }
  0xa7   : > { %v2168_v14 = vcombine.low %v3028_v59, %v1143_v8  ;;  %v1468_v16 = vrot.slane %v1466_v2, 5  ;;  %v1474_v19 = vrot.slane %v1472_v9, 5  ;;  %v1476_v20 = vshrl.u32 %v2214_v56, 16  ;;  %v2428_v56 = vld [vmem:[%s2629_s6 + $0x30] sm:$0xff]   ;;  %v2430_v62 = vld [vmem:[%s2629_s6 + $0x48] sm:$0xff]   ;;  %227 = vst.msk [vmem:[#allocation2 + $0x8] sm:$0xff] %vm225_vm6, %v2422_v45 }
  0xa8   : > { %v1482_v21 = vshll.u32 %v2215_v63, 16  ;;  %v1487_v22 = vshrl.u32 %v2216_v3, 16  ;;  %v1490_v26 = vshll.u32 %v2216_v3, 16  ;;  %v1496_v27 = vshll.u32 %v2217_v10, 16  ;;  %v2431_v63 = vld [vmem:[%s2629_s6 + $0x54] sm:$0xff]   ;;  %v2420_v1 = vld [vmem:[%s2629_s6 + $0x6c] sm:$0xff]  }
  0xa9   : > { %v1469_v25 = vor.u32 %v1468_v16, %v1465_v15  ;;  %v1500_v28 = vshrl.u32 %v2217_v10, 16  ;;  %1021 = vrot.lane.b32.xlu1 %v2128_v13, %s2533_s24  ;;  %1180 = vrot.lane.b32.xlu0 %v2167_v7, %s2530_s17  ;;  %v1478_v30 = vrot.slane %v1476_v20, 4  ;;  %v1506_v33 = vshll.u32 %v2218_v17, 16  ;;  %228 = vst.msk [vmem:[#allocation2 + $0x10] sm:$0xff] %vm225_vm6, %v2424_v46  ;;  %229 = vst.msk [vmem:[#allocation2 + $0x18] sm:$0xff] %vm225_vm6, %v2426_v47  ;;  %s148_s6 = sand.u32 1, %s2502_s10  }
  0xaa   : > { %v1484_v31 = vrot.slane %v1482_v21, 5  ;;  %v1489_v32 = vrot.slane %v1487_v22, 4  ;;  %v1492_v38 = vrot.slane %v1490_v26, 5  ;;  %v1498_v41 = vrot.slane %v1496_v27, 5  ;;  %v480_v54 = vpop.permute.xlu0 %479  ;;  %230 = vst.msk [vmem:[#allocation2 + $0x20] sm:$0xff] %vm225_vm6, %v2428_v56  ;;  %231 = vst.msk [vmem:[#allocation2 + $0x28] sm:$0xff] %vm225_vm6, %v2429_v61 }
  0xab   : > { %v1470_v37 = vrot.slane %v1469_v25, 4  ;;  %v1502_v42 = vrot.slane %v1500_v28, 4  ;;  %v1479_v48 = vor.u32 %v1478_v30, %v1474_v19  ;;  %v1508_v49 = vrot.slane %v1506_v33, 5  ;;  %232 = vst.msk [vmem:[#allocation2 + $0x30] sm:$0xff] %vm225_vm6, %v2430_v62  ;;  %233 = vst.msk [vmem:[#allocation2 + $0x38] sm:$0xff] %vm225_vm6, %v2431_v63  ;;  %s2034_s7 = sshll.u32 %s148_s6, 3 }
  0xac   : > { %v2257_v50 = vrot.slane %v2245_v18, 9  ;;  %v1659_v51 = vrot.slane %v2246_v23, 5  ;;  %v1493_v58 = vor.u32 %v1492_v38, %v1489_v32  ;;  %v1662_v60 = vrot.slane %v2247_v29, 5  ;;  %502 = vst.msk [vmem:[#allocation2] sm:$0xff] %vm501_vm7, %v3045_v12  ;;  %503 = vst.msk [vmem:[#allocation2 + $0x8] sm:$0xff] %vm501_vm7, %v480_v54  ;;  %s150_s18 = scalar_lea.vmem [#allocation3], %s2034_s7 }
  0xad   : > { %v1475_v57 = vsel %vm2676_vm5, %v1470_v37, %v1474_v19  ;;  %v1503_v59 = vor.u32 %v1502_v42, %v1498_v41  ;;  %1182 = vrot.lane.b32.xlu1 %v2168_v14, %s2530_s17  ;;  %1273 = vrot.lane.b32.xlu0 %v2419_v24, %s2529_s8  ;;  %v1480_v2 = vrot.slane %v1479_v48, 4  ;;  %v2258_v7 = vrot.slane %v3056_v34, 9  ;;  %v2427_v19 = vld [vmem:[%s3239_s1 + $0x10] ss:$0 sps:$4 sm:$0x33]   ;;  %666 = vst.msk [vmem:[#allocation2] sm:$0xff] %vm665_vm8, %v3015_v40 }
  0xae   : > { %v1660_v3 = vsel %vm2631_vm2, %v2257_v50, %v1659_v51  ;;  %v1661_v4 = vrot.slane %v1659_v51, 4  ;;  %v1494_v8 = vrot.slane %v1493_v58, 4  ;;  %v1666_v10 = vrot.slane %v2249_v43, 5  ;;  %v1010_v55 = vpop.permute.xlu1 %1009  ;;  %667 = vst.msk [vmem:[#allocation2 + $0x8] sm:$0xff] %vm665_vm8, %v3043_v11  ;;  %2323 = vmatprep.subr.msk.bf16.mxu0 %vm1781_vm13, %v2427_v19  ;;  %2324 = vmatprep.subr.msk.bf16.mxu1 %vm1781_vm13, %v2427_v19  ;;  %s1947_s21 = sshll.u32 %s150_s18, 4  ;;  %s1932_s29 = scalar_lea.sflag [#allocation4], %s148_s6  ;;  %s3182_s21 = int_to_ptr.vmem [resolvable:$true] %s1947_s21 }
  0xaf   : > { %v1504_v9 = vrot.slane %v1503_v59, 4  ;;  %v1669_v13 = vrot.slane %v2250_v52, 5  ;;  %v1485_v15 = vsel %vm2676_vm5, %v1480_v2, %v1484_v31  ;;  %760 = vst.msk [vmem:[#allocation2 + $0x8] sm:$0xff] %vm758_vm9, %v2975_v35  ;;  %759 = vst.msk [vmem:[#allocation2] sm:$0xff] %vm758_vm9, %v2977_v36  ;;  %v1783_v40 = vsel %vm1781_vm13, %v2427_v19, 0 }
  0xb0   : > { %v1663_v14 = vsel %vm2631_vm2, %v1661_v4, %v1662_v60  ;;  %v2225_v16 = vcombine.low %v1475_v57, %v1485_v15  ;;  %v1499_v17 = vsel %vm2676_vm5, %v1494_v8, %v1498_v41  ;;  %v1668_v22 = vrot.slane %v1666_v10, 4  ;;  %1033 = vst.msk [vmem:[#allocation2 + $0x8] sm:$0xff] %vm1031_vm10, %v1010_v55  ;;  %2300 = vmatpush3.bf16.msra.mxu0 %v1783_v40 }
  0xb1   : > { %v1509_v18 = vsel %vm2676_vm5, %v1504_v9, %v1508_v49  ;;  %1275 = vrot.lane.b32.xlu1 %v2420_v1, %s2529_s8  ;;  %v2265_v21 = vcombine.low %v1660_v3, %v1663_v14  ;;  %v1667_v24 = vsel %vm2631_vm2, %v2258_v7, %v1666_v10  ;;  %1194 = vst.msk [vmem:[#allocation2 + $0x8] sm:$0xff] %vm1192_vm11, %v3064_v53  ;;  %s2279_s8 = sshll.u32 %s2514_s13, 1 }
  0xb2   : > { %v2226_v20 = vcombine.low %v1499_v17, %v1509_v18  ;;  %v1008_v23 = vpop.permute.xlu0 %1007  ;;  %1546 = vrot.lane.b32.xlu0 %v2225_v16, %s2534_s30  ;;  %v1670_v12 = vsel %vm2631_vm2, %v1668_v22, %v1669_v13  ;;  %1287 = vst.msk [vmem:[#allocation2 + $0x8] sm:$0xff] %vm1285_vm12, %v2995_v5  ;;  %2322 = vmatpush3.bf16.msra.mxu1 %v1783_v40  ;;  %s1943_s17 = sadd.s32 %s2510_s12, %s2279_s8  ;;  %s2536_s12 = smov [#allocation3]  }
  0xb3   : > { %1032 = vst.msk [vmem:[#allocation2] sm:$0xff] %vm1031_vm10, %v1008_v23  ;;  %v2266_v0 = vcombine.low %v1667_v24, %v1670_v12  ;;  %s2280_s24 = sshll.u32 %s1943_s17, 7  ;;  %s2436_s13 = sshll.u32 %s2536_s12, 4  ;;  %s2437_s13 = int_to_ptr.vmem [resolvable:$false] %s2436_s13 }
  0xb4   : > { %1193 = vst.msk [vmem:[#allocation2] sm:$0xff] %vm1192_vm11, %v3013_v39  ;;  %s3187_s28 = scalar_lea.hbm %s3240_s2, %s2280_s24  ;;  %p2439_p2 = scmp.lt.s32.totalorder %s3182_s21, %s2437_s13 }
  0xb5   : > { %1548 = vrot.lane.b32.xlu1 %v2226_v20, %s2534_s30  ;;  %1286 = vst.msk [vmem:[#allocation2] sm:$0xff] %vm1285_vm12, %v2997_v6  ;;  %s2432_s30 = scalar_lea.vmem %s3182_s21, 128 }
  0xb6   : > { %1707 = vrot.lane.b32.xlu0 %v2265_v21, %s2535_s3  ;;  %p2433_p13 = scmp.ne.s32.totalorder %s3182_s21, %s2432_s30 }
  0xb7   : > { %v1535_v35 = vpop.permute.xlu0 %1534 }
  0xb8   : > { %1559 = vst.msk [vmem:[#allocation2] sm:$0xff] %vm1558_vm14, %v1535_v35  ;;  %p2434_p0 = pnand %p2433_p13, %p2603_p3 }
  0xb9   : > { %1709 = vrot.lane.b32.xlu1 %v2266_v0, %s2535_s3  ;;  %s2438_s3 = scalar_lea.vmem %s2437_s13, 256 }
  0xba   : > { %p2435_p1 = pneg %p2434_p0  ;;  %p2440_p4 = scmp.lt.s32.totalorder %s2438_s3, %s2432_s30 }
  0xbb   : > { %v1696_v36 = vpop.permute.xlu0 %1695  ;;  %v1537_v11 = vpop.permute.xlu1 %1536 }
  0xbc   : > { %1720 = vst.msk [vmem:[#allocation2] sm:$0xff] %vm1719_vm15, %v1696_v36  ;;  %p2441_p5 = por %p2440_p4, %p2439_p2 }
  0xbd   : > { %1560 = vst.msk [vmem:[#allocation2 + $0x8] sm:$0xff] %vm1558_vm14, %v1537_v11 }
  0xbe   : > { %p2442_p6 = pnand %p2441_p5, %p2435_p1 }
  0xbf   : > { %v1698_v39 = vpop.permute.xlu0 %1697 }
  0xc0   : > { %1721 = vst.msk [vmem:[#allocation2 + $0x8] sm:$0xff] %vm1719_vm15, %v1698_v39 }
  0xc1   : > { %v482_v25 = vpop.permute.xlu1 %481 }
  0xc2   : > { %504 = vst.msk [vmem:[#allocation2 + $0x10] sm:$0xff] %vm501_vm7, %v482_v25 }
  0xc3   : > { %v1728_v5 = vld [vmem:[#allocation2] sm:$0xff] }
  0xc4   : > { %2301 = vmatprep.mubr.msk.bf16.mxu0 %vm1756_vm0, %v1728_v5 }
  0xc6   : > { %v646_v26 = vpop.permute.xlu0 %645 }
  0xc7   : > { %v484_v6 = vpop.permute.xlu1 %483  ;;  %668 = vst.msk [vmem:[#allocation2 + $0x10] sm:$0xff] %vm665_vm8, %v646_v26  ;;  %v1729_v27 = vld [vmem:[#allocation2 + $0x8] sm:$0xff] }
  0xc8   : > { %505 = vst.msk [vmem:[#allocation2 + $0x18] sm:$0xff] %vm501_vm7, %v484_v6  ;;  %2302 = vmatmul.mubr.msk.bf16.vlgmr.msra.gmra.mrb[0].mxu0 %vm1756_vm0, %v1729_v27 }
  0xca   : > { %v739_v29 = vpop.permute.xlu0 %738 }
  0xcb   : > { %v648_v28 = vpop.permute.xlu1 %647  ;;  %761 = vst.msk [vmem:[#allocation2 + $0x10] sm:$0xff] %vm758_vm9, %v739_v29 }
  0xcc   : > { %669 = vst.msk [vmem:[#allocation2 + $0x18] sm:$0xff] %vm665_vm8, %v648_v28 }
  0xcf   : > { %v741_v30 = vpop.permute.xlu1 %740 }
  0xd0   : > { %762 = vst.msk [vmem:[#allocation2 + $0x18] sm:$0xff] %vm758_vm9, %v741_v30  ;;  %v1012_v31 = vpop.permute.xlu0 %1011 }
  0xd1   : > { %1034 = vst.msk [vmem:[#allocation2 + $0x10] sm:$0xff] %vm1031_vm10, %v1012_v31 }
  0xd3   : > { %v1014_v32 = vpop.permute.xlu1 %1013 }
  0xd4   : > { %1035 = vst.msk [vmem:[#allocation2 + $0x18] sm:$0xff] %vm1031_vm10, %v1014_v32  ;;  %v1173_v33 = vpop.permute.xlu0 %1172 }
  0xd5   : > { %1195 = vst.msk [vmem:[#allocation2 + $0x10] sm:$0xff] %vm1192_vm11, %v1173_v33 }
  0xd7   : > { %v1175_v34 = vpop.permute.xlu1 %1174 }
  0xd8   : > { %1196 = vst.msk [vmem:[#allocation2 + $0x18] sm:$0xff] %vm1192_vm11, %v1175_v34  ;;  %v1266_v37 = vpop.permute.xlu0 %1265 }
  0xd9   : > { %1288 = vst.msk [vmem:[#allocation2 + $0x10] sm:$0xff] %vm1285_vm12, %v1266_v37 }
  0xdb   : > { %v1268_v38 = vpop.permute.xlu1 %1267 }
  0xdc   : > { %1289 = vst.msk [vmem:[#allocation2 + $0x18] sm:$0xff] %vm1285_vm12, %v1268_v38  ;;  %v1539_v41 = vpop.permute.xlu0 %1538 }
  0xdd   : > { %1561 = vst.msk [vmem:[#allocation2 + $0x10] sm:$0xff] %vm1558_vm14, %v1539_v41 }
  0xdf   : > { %v1541_v42 = vpop.permute.xlu1 %1540 }
  0xe0   : > { %1562 = vst.msk [vmem:[#allocation2 + $0x18] sm:$0xff] %vm1558_vm14, %v1541_v42  ;;  %v1700_v43 = vpop.permute.xlu0 %1699 }
  0xe1   : > { %1722 = vst.msk [vmem:[#allocation2 + $0x10] sm:$0xff] %vm1719_vm15, %v1700_v43 }
  0xe4   : > { %v1702_v45 = vpop.permute.xlu0 %1701 }
  0xe5   : > { %v486_v44 = vpop.permute.xlu1 %485  ;;  %1723 = vst.msk [vmem:[#allocation2 + $0x18] sm:$0xff] %vm1719_vm15, %v1702_v45 }
  0xe6   : > { %506 = vst.msk [vmem:[#allocation2 + $0x20] sm:$0xff] %vm501_vm7, %v486_v44 }
  0xe8   : > { %v1730_v46 = vld [vmem:[#allocation2 + $0x10] sm:$0xff] }
  0xe9   : > { %2305 = vmatprep.mubr.msk.bf16.mxu0 %vm1756_vm0, %v1730_v46 }
  0xea   : > { %v650_v47 = vpop.permute.xlu0 %649 }
  0xeb   : > { %v488_v48 = vpop.permute.xlu1 %487  ;;  %670 = vst.msk [vmem:[#allocation2 + $0x20] sm:$0xff] %vm665_vm8, %v650_v47 }
  0xec   : > { %507 = vst.msk [vmem:[#allocation2 + $0x28] sm:$0xff] %vm501_vm7, %v488_v48  ;;  %v1731_v49 = vld [vmem:[#allocation2 + $0x18] sm:$0xff] }
  0xed   : > { %2306 = vmatmul.mubr.msk.bf16.gmra.mrb[4].mxu0 %vm1756_vm0, %v1731_v49 }
  0xee   : > { %v743_v50 = vpop.permute.xlu0 %742 }
  0xef   : > { %v652_v51 = vpop.permute.xlu1 %651  ;;  %763 = vst.msk [vmem:[#allocation2 + $0x20] sm:$0xff] %vm758_vm9, %v743_v50 }
  0xf0   : > { %671 = vst.msk [vmem:[#allocation2 + $0x28] sm:$0xff] %vm665_vm8, %v652_v51 }
  0xf3   : > { %v745_v52 = vpop.permute.xlu1 %744  ;;  %v1016_v53 = vpop.permute.xlu0 %1015 }
  0xf4   : > { %764 = vst.msk [vmem:[#allocation2 + $0x28] sm:$0xff] %vm758_vm9, %v745_v52 }
  0xf5   : > { %1036 = vst.msk [vmem:[#allocation2 + $0x20] sm:$0xff] %vm1031_vm10, %v1016_v53 }
  0xf7   : > { %v1018_v54 = vpop.permute.xlu1 %1017  ;;  %v1177_v56 = vpop.permute.xlu0 %1176 }
  0xf8   : > { %1037 = vst.msk [vmem:[#allocation2 + $0x28] sm:$0xff] %vm1031_vm10, %v1018_v54 }
  0xf9   : > { %1197 = vst.msk [vmem:[#allocation2 + $0x20] sm:$0xff] %vm1192_vm11, %v1177_v56 }
  0xfb   : > { %v1179_v57 = vpop.permute.xlu1 %1178  ;;  %v1270_v58 = vpop.permute.xlu0 %1269 }
  0xfc   : > { %1198 = vst.msk [vmem:[#allocation2 + $0x28] sm:$0xff] %vm1192_vm11, %v1179_v57 }
  0xfd   : > { %1290 = vst.msk [vmem:[#allocation2 + $0x20] sm:$0xff] %vm1285_vm12, %v1270_v58 }
  0xff   : > { %v1272_v59 = vpop.permute.xlu1 %1271 }
 0x100   : > { %1291 = vst.msk [vmem:[#allocation2 + $0x28] sm:$0xff] %vm1285_vm12, %v1272_v59  ;;  %v1543_v60 = vpop.permute.xlu0 %1542 }
 0x101   : > { %1563 = vst.msk [vmem:[#allocation2 + $0x20] sm:$0xff] %vm1558_vm14, %v1543_v60 }
 0x103   : > { %v1545_v61 = vpop.permute.xlu1 %1544 }
 0x104   : > { %1564 = vst.msk [vmem:[#allocation2 + $0x28] sm:$0xff] %vm1558_vm14, %v1545_v61  ;;  %v1704_v62 = vpop.permute.xlu0 %1703 }
 0x105   : > { %1724 = vst.msk [vmem:[#allocation2 + $0x20] sm:$0xff] %vm1719_vm15, %v1704_v62 }
 0x108   : > { %v1706_v1 = vpop.permute.xlu0 %1705 }
 0x109   : > { %v490_v63 = vpop.permute.xlu1 %489  ;;  %1725 = vst.msk [vmem:[#allocation2 + $0x28] sm:$0xff] %vm1719_vm15, %v1706_v1 }
 0x10a   : > { %508 = vst.msk [vmem:[#allocation2 + $0x30] sm:$0xff] %vm501_vm7, %v490_v63 }
 0x10c   : > { %v1732_v2 = vld [vmem:[#allocation2 + $0x20] sm:$0xff] }
 0x10d   : > { %2309 = vmatprep.mubr.msk.bf16.mxu1 %vm1756_vm0, %v1732_v2 }
 0x10e   : > { %v654_v3 = vpop.permute.xlu0 %653 }
 0x10f   : > { %v492_v4 = vpop.permute.xlu1 %491  ;;  %672 = vst.msk [vmem:[#allocation2 + $0x30] sm:$0xff] %vm665_vm8, %v654_v3 }
 0x110   : > { %509 = vst.msk [vmem:[#allocation2 + $0x38] sm:$0xff] %vm501_vm7, %v492_v4  ;;  %v1733_v7 = vld [vmem:[#allocation2 + $0x28] sm:$0xff] }
 0x111   : > { %2310 = vmatmul.mubr.msk.bf16.vlgmr.msra.gmra.mrb[0].mxu1 %vm1756_vm0, %v1733_v7 }
 0x112   : > { %v747_v8 = vpop.permute.xlu0 %746 }
 0x113   : > { %v656_v9 = vpop.permute.xlu1 %655  ;;  %765 = vst.msk [vmem:[#allocation2 + $0x30] sm:$0xff] %vm758_vm9, %v747_v8 }
 0x114   : > { %673 = vst.msk [vmem:[#allocation2 + $0x38] sm:$0xff] %vm665_vm8, %v656_v9 }
 0x117   : > { %v749_v10 = vpop.permute.xlu1 %748  ;;  %v1020_v13 = vpop.permute.xlu0 %1019 }
 0x118   : > { %766 = vst.msk [vmem:[#allocation2 + $0x38] sm:$0xff] %vm758_vm9, %v749_v10 }
 0x119   : > { %1038 = vst.msk [vmem:[#allocation2 + $0x30] sm:$0xff] %vm1031_vm10, %v1020_v13 }
 0x11b   : > { %v1022_v15 = vpop.permute.xlu1 %1021  ;;  %v1181_v14 = vpop.permute.xlu0 %1180 }
 0x11c   : > { %1039 = vst.msk [vmem:[#allocation2 + $0x38] sm:$0xff] %vm1031_vm10, %v1022_v15 }
 0x11d   : > { %1199 = vst.msk [vmem:[#allocation2 + $0x30] sm:$0xff] %vm1192_vm11, %v1181_v14 }
 0x11f   : > { %v1183_v16 = vpop.permute.xlu1 %1182  ;;  %v1274_v17 = vpop.permute.xlu0 %1273 }
 0x120   : > { %1200 = vst.msk [vmem:[#allocation2 + $0x38] sm:$0xff] %vm1192_vm11, %v1183_v16 }
 0x121   : > { %1292 = vst.msk [vmem:[#allocation2 + $0x30] sm:$0xff] %vm1285_vm12, %v1274_v17 }
 0x123   : > { %v1276_v18 = vpop.permute.xlu1 %1275 }
 0x124   : > { %1293 = vst.msk [vmem:[#allocation2 + $0x38] sm:$0xff] %vm1285_vm12, %v1276_v18  ;;  %v1547_v19 = vpop.permute.xlu0 %1546 }
 0x125   : > { %1565 = vst.msk [vmem:[#allocation2 + $0x30] sm:$0xff] %vm1558_vm14, %v1547_v19 }
 0x127   : > { %v1549_v20 = vpop.permute.xlu1 %1548 }
 0x128   : > { %1566 = vst.msk [vmem:[#allocation2 + $0x38] sm:$0xff] %vm1558_vm14, %v1549_v20  ;;  %v1708_v21 = vpop.permute.xlu0 %1707 }
 0x129   : > { %1726 = vst.msk [vmem:[#allocation2 + $0x30] sm:$0xff] %vm1719_vm15, %v1708_v21 }
 0x12b   : > { %v1710_v22 = vpop.permute.xlu1 %1709 }
 0x12c   : > { %1727 = vst.msk [vmem:[#allocation2 + $0x38] sm:$0xff] %vm1719_vm15, %v1710_v22 }
 0x130   : > { %v1734_v55 = vld [vmem:[#allocation2 + $0x30] sm:$0xff] }
 0x131   : > { %2313 = vmatprep.mubr.msk.bf16.mxu1 %vm1756_vm0, %v1734_v55 }
 0x133   : > { %v1735_v23 = vld [vmem:[#allocation2 + $0x38] sm:$0xff] }
 0x134   : > { %2314 = vmatmul.mubr.msk.bf16.gmra.mrb[4].mxu1 %vm1756_vm0, %v1735_v23 }
 0x19b   : > { %v2303_v24 = vpop.f32.mrb[0].mxu0 }
 0x19c   : > { %v1819_v12 = vpop.f32.mrb[1].mxu0  ;;  %v1884_v11 = vmax.f32 %v2303_v24, 0.0 }
 0x19d   : > { %v1882_v40 = vmax.f32 %v1819_v12, 0.0  ;;  %v2304_v0 = vpop.f32.mrb[2].mxu0 }
 0x19e   : > { %v1822_v35 = vpop.f32.mrb[3].mxu0  ;;  %v1885_v39 = vmax.f32 %v2304_v0, 0.0 }
 0x19f   : > { %1898 = vxpose.xlu0.b32.start [1/16] (narrow) %v1882_v40, 8  ;;  %v1883_v36 = vmax.f32 %v1822_v35, 0.0 }
 0x1a3   : > { %1899 = vxpose.xlu0.b32.cont [2/16] (narrow) %v1883_v36, 8 }
 0x1a7   : > { %1900 = vxpose.xlu0.b32.cont [3/16] (narrow) %v1884_v11, 8 }
 0x1ab   : > { %1901 = vxpose.xlu0.b32.cont [4/16] (narrow) %v1885_v39, 8 }
 0x1c0   : > { %v2307_v25 = vpop.f32.mrb[4].mxu0 }
 0x1c1   : > { %v1835_v5 = vpop.f32.mrb[5].mxu0  ;;  %v1888_v29 = vmax.f32 %v2307_v25, 0.0 }
 0x1c2   : > { %v1886_v6 = vmax.f32 %v1835_v5, 0.0  ;;  %v2308_v26 = vpop.f32.mrb[6].mxu0 }
 0x1c3   : > { %v1838_v27 = vpop.f32.mrb[7].mxu0  ;;  %v1889_v30 = vmax.f32 %v2308_v26, 0.0 }
 0x1c4   : > { %1902 = vxpose.xlu0.b32.cont [5/16] (narrow) %v1886_v6, 8  ;;  %v1887_v28 = vmax.f32 %v1838_v27, 0.0 }
 0x1c8   : > { %1903 = vxpose.xlu0.b32.cont [6/16] (narrow) %v1887_v28, 8 }
 0x1cc   : > { %1904 = vxpose.xlu0.b32.cont [7/16] (narrow) %v1888_v29, 8 }
 0x1d0   : > { %1905 = vxpose.xlu0.b32.cont [8/16] (narrow) %v1889_v30, 8 }
 0x1e4   : > { %v2311_v31 = vpop.f32.mrb[0].mxu1 }
 0x1e5   : > { %v1851_v32 = vpop.f32.mrb[1].mxu1  ;;  %v1892_v41 = vmax.f32 %v2311_v31, 0.0 }
 0x1e6   : > { %v1890_v33 = vmax.f32 %v1851_v32, 0.0  ;;  %v2312_v34 = vpop.f32.mrb[2].mxu1 }
 0x1e7   : > { %v1854_v37 = vpop.f32.mrb[3].mxu1  ;;  %v1893_v42 = vmax.f32 %v2312_v34, 0.0 }
 0x1e8   : > { %1906 = vxpose.xlu0.b32.cont [9/16] (narrow) %v1890_v33, 8  ;;  %v1891_v38 = vmax.f32 %v1854_v37, 0.0 }
 0x1ec   : > { %1907 = vxpose.xlu0.b32.cont [10/16] (narrow) %v1891_v38, 8 }
 0x1f0   : > { %1908 = vxpose.xlu0.b32.cont [11/16] (narrow) %v1892_v41, 8 }
 0x1f4   : > { %1909 = vxpose.xlu0.b32.cont [12/16] (narrow) %v1893_v42, 8 }
 0x207   : > { %v2315_v43 = vpop.f32.mrb[4].mxu1 }
 0x208   : > { %v1867_v44 = vpop.f32.mrb[5].mxu1  ;;  %v1896_v49 = vmax.f32 %v2315_v43, 0.0 }
 0x209   : > { %v1894_v45 = vmax.f32 %v1867_v44, 0.0  ;;  %v2316_v46 = vpop.f32.mrb[6].mxu1 }
 0x20a   : > { %v1870_v47 = vpop.f32.mrb[7].mxu1  ;;  %v1897_v50 = vmax.f32 %v2316_v46, 0.0 }
 0x20b   : > { %1910 = vxpose.xlu0.b32.cont [13/16] (narrow) %v1894_v45, 8  ;;  %v1895_v48 = vmax.f32 %v1870_v47, 0.0 }
 0x20f   : > { %1911 = vxpose.xlu0.b32.cont [14/16] (narrow) %v1895_v48, 8 }
 0x213   : > { %1912 = vxpose.xlu0.b32.cont [15/16] (narrow) %v1896_v49, 8 }
 0x217   : > { %1913 = vxpose.xlu0.b32.end [16/16] (narrow) %v1897_v50, 8 }
 0x25b   : > { %v1914_v51 = vpop.trf.xlu0 }
 0x25c   : > { %1930 = vst [vmem:[%s150_s18] sm:$0xff] %v1914_v51 }
 0x25d   : > { %2445 = shalt.err (!%p2442_p6)
}
 0x25e   : > { %s2446_s4 = scalar_lea.hbm %s3187_s28, 128  ;;  %s2450_s7 = scalar_lea.hbm %s3240_s2, 512 }
 0x25f   : > { %p2447_p7 = scmp.ne.s32.totalorder %s3187_s28, %s2446_s4  ;;  %p2451_p11 = scmp.lt.u32.totalorder %s3187_s28, %s3240_s2 }
 0x260   : > { %p2452_p12 = scmp.lt.u32.totalorder %s2450_s7, %s2446_s4  ;;  %p2454_p0 = scmp.lt.u32.totalorder %s2446_s4, %s3187_s28 }
 0x261   : > { %p2448_p9 = pnand %p2447_p7, %p2603_p3 }
 0x262   : > { %p2453_p13 = por %p2452_p12, %p2451_p11 }
 0x263   : > { %p2449_p10 = pneg %p2448_p9 }
 0x264   : > { %p2455_p1 = por %p2454_p0, %p2453_p13 }
 0x266   : > { %p2456_p2 = pnand %p2455_p1, %p2449_p10 }
 0x268   : > { %2459 = shalt.err (!%p2456_p2)
}
 0x269   : > { %2326 = dma.vmem_to_hbm [thread:$0]  (%p2603_p3), %s3182_s21, 128, %s3187_s28, %s1932_s29  }
 0x26a PF: > { %p2332_p4 = scmp.ge.s32.totalorder %s2526_s16, 2  ;;  %s1959_s18 = sand.u32 1, %s2498_s9  }
 0x26b   : > { %s1960_s24 = scalar_lea.sflag [#allocation4], %s1959_s18 }
 0x26c   : > { %p2329_p5 = pnand %p2332_p4, %p2612_p8 }
 0x26e   : > { %2493 = dma.done.wait (!%p2329_p5), %s1960_s24, 128  }
 0x26f   : > { %2495 = vsyncadd (!%p2329_p5), %s1960_s24, 4294967168  ;;  %s15_s16 = sadd.s32 1, %s2526_s16   ;;  %s3247_s9 = smov %s2502_s10 }
 0x270   : > { %p12_p6 = scmp.ge.s32.totalorder %s15_s16, 6   ;;  %s3248_s10 = smov %s2506_s11 }
 0x271   : > { %s3249_s11 = smov %s2621_s27  ;;  %s3250_s12 = smov %s2518_s14 }
 0x272   : > { %s3251_s13 = smov %s2522_s15  ;;  %s3252_s14 = smov %s3255_s19 }
 0x273   : > { %s3253_s15 = smov %s3259_s20  ;;  %14 = sbr.rel (!%p12_p6) target bundleno = 5 (0x5), region = 66 }
 0x27a   :  { %1965 = vsyncpa [#allocation4], 1 }
 0x27b   :  { %1967 = vsyncpa [#allocation4 + $0x1], 1 }

</bundles_post_ra>
